<compile_context>
chip_gen: v7x
topology: tpu7x:2x2x1
jax: 0.10.0
libtpu: 0.0.40
codegen_flags: <defaults>
</compile_context>

<pallas_src>
import functools
import math

import jax
import jax.numpy as jnp
from jax import lax
from jax.experimental import pallas as pl
from jax.experimental.pallas import tpu as pltpu

# ---------------- small synthetic mBERT config ----------------
VOCAB = 100
TYPE_VOCAB = 2
MAX_POS = 16
HIDDEN = 32
N_LAYERS = 2
N_HEADS = 4
HEAD_DIM = HIDDEN // N_HEADS
INTER = 64
NUM_LABELS = 1          # regression head
LN_EPS = 1e-12


# ---------------- fused forward kernel ----------------
def _fused_forward_kernel(
    emb_ref, mask_ref, labels_ref,
    emb_g_ref, emb_b_ref,
    wqkv_ref, bqkv_ref, wo_ref, bo_ref,
    ln1g_ref, ln1b_ref,
    w1_ref, b1_ref, w2_ref, b2_ref,
    ln2g_ref, ln2b_ref,
    poolw_ref, poolb_ref, clsw_ref, clsb_ref,
    loss_ref, logits_ref,
    ctx_ref,
    *, batch, seq,
):
    f32 = jnp.float32
    scale = 1.0 / math.sqrt(HEAD_DIM)

    def layernorm(h, g, b):
        mu = jnp.mean(h, axis=-1, keepdims=True)
        var = jnp.mean((h - mu) ** 2, axis=-1, keepdims=True)
        return (h - mu) * lax.rsqrt(var + LN_EPS) * g + b

    def gelu(y):
        # TODO(synk): HF BERT uses exact erf-GELU; tanh approximation used for
        # guaranteed Mosaic lowering (small numerical drift vs PyTorch ref).
        c = math.sqrt(2.0 / math.pi)
        return 0.5 * y * (1.0 + jnp.tanh(c * (y + 0.044715 * y * y * y)))

    # Combined additive attention bias (block-diagonal batch mask + key
    # padding), hoisted once for all layers / heads: [B*S, B*S].
    attn_bias = mask_ref[...]

    # Embedding LayerNorm (no residual). Dropout omitted (eval mode).
    x = layernorm(emb_ref[...], emb_g_ref[...], emb_b_ref[...])       # [B*S, H]

    for l in range(N_LAYERS):                    # static unroll (N_LAYERS == 2)
        # Fused QKV projection: one [B*S, H] x [H, 3H] MXU pass.
        qkv = jnp.dot(x, wqkv_ref[l], preferred_element_type=f32) + bqkv_ref[l]

        # Per-head attention over the flattened token axis; cross-batch terms
        # and padded keys are removed by the single additive bias, so the
        # batch loop disappears and every op spans all B*S sublanes.
        for h in range(N_HEADS):
            c0 = h * HEAD_DIM
            qh = qkv[:, c0:c0 + HEAD_DIM]                             # [B*S, hd]
            kh = qkv[:, HIDDEN + c0:HIDDEN + c0 + HEAD_DIM]
            vh = qkv[:, 2 * HIDDEN + c0:2 * HIDDEN + c0 + HEAD_DIM]
            s = lax.dot_general(qh, kh, (((1,), (1,)), ((), ())),
                                preferred_element_type=f32) * scale   # [BS, BS]
            s = s + attn_bias
            mx = jnp.max(s, axis=-1, keepdims=True)
            e = jnp.exp(s - mx)
            inv = pl.reciprocal(jnp.sum(e, axis=-1, keepdims=True), approx=True)
            ctx_ref[:, c0:c0 + HEAD_DIM] = jnp.dot(
                e * inv, vh, preferred_element_type=f32)

        attn_out = jnp.dot(ctx_ref[...], wo_ref[l],
                           preferred_element_type=f32) + bo_ref[l]
        x = layernorm(attn_out + x, ln1g_ref[l], ln1b_ref[l])

        hmid = gelu(jnp.dot(x, w1_ref[l], preferred_element_type=f32) + b1_ref[l])
        ffn = jnp.dot(hmid, w2_ref[l], preferred_element_type=f32) + b2_ref[l]
        x = layernorm(ffn + x, ln2g_ref[l], ln2b_ref[l])

    # CLS rows (token 0 of each sequence) -> pooler -> classifier -> MSE,
    # all on [B, .] tiles (no pooler/classifier work on non-CLS rows).
    cls = jnp.concatenate([x[b * seq:b * seq + 1, :] for b in range(batch)],
                          axis=0)                                     # [B, H]
    pooled = jnp.tanh(jnp.dot(cls, poolw_ref[...], preferred_element_type=f32)
                      + poolb_ref[...])                               # [B, H]
    logits = jnp.dot(pooled, clsw_ref[...],
                     preferred_element_type=f32) + clsb_ref[...]      # [B, NL]
    logits_ref[...] = logits

    # loss = MSELoss(logits.squeeze(), labels.squeeze())  (num_labels == 1)
    d = logits - labels_ref[...]
    per_row = jnp.sum(d * d, axis=1, keepdims=True)                   # [B, 1]
    total = jnp.sum(per_row, axis=0, keepdims=True)                   # [1, 1]
    loss_ref[...] = total * (1.0 / float(batch * NUM_LABELS))


# ---------------- parameter init (deterministic, synthetic) ----------------
def init_params(key):
    keys = iter(jax.random.split(key, 16))

    def w(shape):
        return jax.random.normal(next(keys), shape, jnp.float32) * 0.02

    L, H = N_LAYERS, HIDDEN
    return {
        "word_emb": w((VOCAB, H)),
        "pos_emb": w((MAX_POS, H)),
        "type_emb": w((TYPE_VOCAB, H)),
        "emb_ln_g": jnp.ones((1, H), jnp.float32),
        "emb_ln_b": jnp.zeros((1, H), jnp.float32),
        # fused QKV weights [Q | K | V] along the output dim
        "w_qkv": w((L, H, 3 * H)),
        "b_qkv": jnp.zeros((L, 1, 3 * H), jnp.float32),
        "w_o": w((L, H, H)),
        "b_o": jnp.zeros((L, 1, H), jnp.float32),
        "ln1_g": jnp.ones((L, 1, H), jnp.float32),
        "ln1_b": jnp.zeros((L, 1, H), jnp.float32),
        "w_ffn1": w((L, H, INTER)),
        "b_ffn1": jnp.zeros((L, 1, INTER), jnp.float32),
        "w_ffn2": w((L, INTER, H)),
        "b_ffn2": jnp.zeros((L, 1, H), jnp.float32),
        "ln2_g": jnp.ones((L, 1, H), jnp.float32),
        "ln2_b": jnp.zeros((L, 1, H), jnp.float32),
        "pool_w": w((H, H)),
        "pool_b": jnp.zeros((1, H), jnp.float32),
        "cls_w": w((H, NUM_LABELS)),
        "cls_b": jnp.zeros((1, NUM_LABELS), jnp.float32),
    }


# ---------------- forward ----------------
def mbert_forward(params, input_ids, attention_mask, token_type_ids, labels):
    B, S = input_ids.shape
    H = HIDDEN

    # Embedding gather is glue (stays in JAX); everything else is one kernel.
    pos_ids = jnp.arange(S)
    emb = (params["word_emb"][input_ids]
           + params["pos_emb"][pos_ids][None, :, :]
           + params["type_emb"][token_type_ids]).astype(jnp.float32)
    emb = emb.reshape(B * S, H)

    # Combined additive attention bias over the flattened token axis:
    # 0 where (same batch AND key not padded), -1e9 otherwise.  [B*S, B*S]
    batch_ids = jnp.repeat(jnp.arange(B), S)
    same_batch = batch_ids[:, None] == batch_ids[None, :]
    key_keep = (attention_mask.reshape(-1) > 0)[None, :]
    attn_bias = jnp.where(same_batch & key_keep, 0.0, -1e9).astype(jnp.float32)

    labels2d = labels.reshape(B, NUM_LABELS).astype(jnp.float32)

    vmem = pl.BlockSpec(memory_space=pltpu.MemorySpace.VMEM)
    n_inputs = 21

    loss2d, logits = pl.pallas_call(
        functools.partial(_fused_forward_kernel, batch=B, seq=S),
        out_shape=(jax.ShapeDtypeStruct((1, 1), jnp.float32),
                   jax.ShapeDtypeStruct((B, NUM_LABELS), jnp.float32)),
        in_specs=[vmem] * n_inputs,
        out_specs=(vmem, vmem),
        scratch_shapes=[pltpu.VMEM((B * S, H), jnp.float32)],
    )(emb, attn_bias, labels2d,
      params["emb_ln_g"], params["emb_ln_b"],
      params["w_qkv"], params["b_qkv"], params["w_o"], params["b_o"],
      params["ln1_g"], params["ln1_b"],
      params["w_ffn1"], params["b_ffn1"], params["w_ffn2"], params["b_ffn2"],
      params["ln2_g"], params["ln2_b"],
      params["pool_w"], params["pool_b"], params["cls_w"], params["cls_b"])

    return loss2d[0, 0], logits


if __name__ == "__main__":
    key = jax.random.PRNGKey(0)
    pkey, ikey, lkey = jax.random.split(key, 3)
    params = init_params(pkey)

    B, S = 2, 8
    input_ids = jax.random.randint(ikey, (B, S), 0, VOCAB, dtype=jnp.int32)
    attention_mask = jnp.array([[1, 1, 1, 1, 1, 1, 1, 1],
                                [1, 1, 1, 1, 1, 1, 0, 0]], dtype=jnp.int32)
    token_type_ids = jnp.zeros((B, S), dtype=jnp.int32)
    labels = jax.random.normal(lkey, (B,), jnp.float32)

    fwd = jax.jit(mbert_forward)
    loss, logits = fwd(params, input_ids, attention_mask, token_type_ids, labels)
    jax.block_until_ready((loss, logits))
    assert logits.shape == (B, NUM_LABELS)
    assert loss.shape == ()
    print("KERNEL_OK")
</pallas_src>

<mosaic_0001>
module attributes {stable_mosaic.version = 11 : i64} {
  func.func @_fused_forward_kernel(%arg0: memref<16x32xf32, #tpu.memory_space<vmem>>, %arg1: memref<16x16xf32, #tpu.memory_space<vmem>>, %arg2: memref<2x1xf32, #tpu.memory_space<vmem>>, %arg3: memref<1x32xf32, #tpu.memory_space<vmem>>, %arg4: memref<1x32xf32, #tpu.memory_space<vmem>>, %arg5: memref<2x32x96xf32, #tpu.memory_space<vmem>>, %arg6: memref<2x1x96xf32, #tpu.memory_space<vmem>>, %arg7: memref<2x32x32xf32, #tpu.memory_space<vmem>>, %arg8: memref<2x1x32xf32, #tpu.memory_space<vmem>>, %arg9: memref<2x1x32xf32, #tpu.memory_space<vmem>>, %arg10: memref<2x1x32xf32, #tpu.memory_space<vmem>>, %arg11: memref<2x32x64xf32, #tpu.memory_space<vmem>>, %arg12: memref<2x1x64xf32, #tpu.memory_space<vmem>>, %arg13: memref<2x64x32xf32, #tpu.memory_space<vmem>>, %arg14: memref<2x1x32xf32, #tpu.memory_space<vmem>>, %arg15: memref<2x1x32xf32, #tpu.memory_space<vmem>>, %arg16: memref<2x1x32xf32, #tpu.memory_space<vmem>>, %arg17: memref<32x32xf32, #tpu.memory_space<vmem>>, %arg18: memref<1x32xf32, #tpu.memory_space<vmem>>, %arg19: memref<32x1xf32, #tpu.memory_space<vmem>>, %arg20: memref<1x1xf32, #tpu.memory_space<vmem>>, %arg21: memref<1x1xf32, #tpu.memory_space<vmem>>, %arg22: memref<2x1xf32, #tpu.memory_space<vmem>>, %arg23: memref<16x32xf32, #tpu.memory_space<vmem>>) attributes {dimension_semantics = [], scalar_prefetch = 0 : i64, scratch_operands = 1 : i64, tpu.core_type = #tpu.core_type<tc>} {
    %c0 = arith.constant 0 : index
    %c0_0 = arith.constant 0 : index
    %0 = vector.load %arg1[%c0, %c0_0] : memref<16x16xf32, #tpu.memory_space<vmem>>, vector<16x16xf32>
    %c0_1 = arith.constant 0 : index
    %c0_2 = arith.constant 0 : index
    %1 = vector.load %arg0[%c0_1, %c0_2] : memref<16x32xf32, #tpu.memory_space<vmem>>, vector<16x32xf32>
    %c0_3 = arith.constant 0 : index
    %c0_4 = arith.constant 0 : index
    %2 = vector.load %arg3[%c0_3, %c0_4] : memref<1x32xf32, #tpu.memory_space<vmem>>, vector<1x32xf32>
    %c0_5 = arith.constant 0 : index
    %c0_6 = arith.constant 0 : index
    %3 = vector.load %arg4[%c0_5, %c0_6] : memref<1x32xf32, #tpu.memory_space<vmem>>, vector<1x32xf32>
    %cst = arith.constant dense<0.000000e+00> : vector<16xf32>
    %4 = vector.multi_reduction <add>, %1, %cst [1] : vector<16x32xf32> to vector<16xf32>
    %5 = vector.shape_cast %4 : vector<16xf32> to vector<16x1xf32>
    %cst_7 = arith.constant 3.200000e+01 : f32
    %6 = vector.broadcast %cst_7 : f32 to vector<16x1xf32>
    %7 = arith.divf %5, %6 : vector<16x1xf32>
    %8 = vector.broadcast %7 : vector<16x1xf32> to vector<16x32xf32>
    %9 = arith.subf %1, %8 : vector<16x32xf32>
    %10 = arith.mulf %9, %9 : vector<16x32xf32>
    %cst_8 = arith.constant dense<0.000000e+00> : vector<16xf32>
    %11 = vector.multi_reduction <add>, %10, %cst_8 [1] : vector<16x32xf32> to vector<16xf32>
    %12 = vector.shape_cast %11 : vector<16xf32> to vector<16x1xf32>
    %cst_9 = arith.constant 3.200000e+01 : f32
    %13 = vector.broadcast %cst_9 : f32 to vector<16x1xf32>
    %14 = arith.divf %12, %13 : vector<16x1xf32>
    %15 = vector.broadcast %7 : vector<16x1xf32> to vector<16x32xf32>
    %16 = arith.subf %1, %15 : vector<16x32xf32>
    %cst_10 = arith.constant 9.99999996E-13 : f32
    %17 = vector.broadcast %cst_10 : f32 to vector<16x1xf32>
    %18 = arith.addf %14, %17 : vector<16x1xf32>
    %19 = math.rsqrt %18 : vector<16x1xf32>
    %20 = vector.broadcast %19 : vector<16x1xf32> to vector<16x32xf32>
    %21 = arith.mulf %16, %20 : vector<16x32xf32>
    %22 = vector.broadcast %2 : vector<1x32xf32> to vector<16x32xf32>
    %23 = arith.mulf %21, %22 : vector<16x32xf32>
    %24 = vector.broadcast %3 : vector<1x32xf32> to vector<16x32xf32>
    %25 = arith.addf %23, %24 : vector<16x32xf32>
    %c0_11 = arith.constant 0 : index
    %c0_12 = arith.constant 0 : index
    %c0_13 = arith.constant 0 : index
    %26 = vector.load %arg5[%c0_11, %c0_12, %c0_13] : memref<2x32x96xf32, #tpu.memory_space<vmem>>, vector<1x32x96xf32>
    %27 = vector.shape_cast %26 : vector<1x32x96xf32> to vector<32x96xf32>
    %cst_14 = arith.constant dense<0.000000e+00> : vector<16x96xf32>
    %28 = tpu.matmul %25, %27, %cst_14 {dimension_numbers = #tpu.dot_dimension_numbers<[1], [0], [0], [1], [0, 0, 1, 1], [], []>} : vector<16x32xf32>, vector<32x96xf32>, vector<16x96xf32> -> vector<16x96xf32>
    %c0_15 = arith.constant 0 : index
    %c0_16 = arith.constant 0 : index
    %c0_17 = arith.constant 0 : index
    %29 = vector.load %arg6[%c0_15, %c0_16, %c0_17] : memref<2x1x96xf32, #tpu.memory_space<vmem>>, vector<1x1x96xf32>
    %30 = vector.shape_cast %29 : vector<1x1x96xf32> to vector<1x96xf32>
    %31 = vector.broadcast %30 : vector<1x96xf32> to vector<16x96xf32>
    %32 = arith.addf %28, %31 : vector<16x96xf32>
    %33 = vector.extract_strided_slice %32 {offsets = [0, 0], sizes = [16, 8], strides = [1, 1]} : vector<16x96xf32> to vector<16x8xf32>
    %34 = vector.extract_strided_slice %32 {offsets = [0, 32], sizes = [16, 8], strides = [1, 1]} : vector<16x96xf32> to vector<16x8xf32>
    %35 = vector.extract_strided_slice %32 {offsets = [0, 64], sizes = [16, 8], strides = [1, 1]} : vector<16x96xf32> to vector<16x8xf32>
    %cst_18 = arith.constant dense<0.000000e+00> : vector<16x16xf32>
    %36 = tpu.matmul %33, %34, %cst_18 {dimension_numbers = #tpu.dot_dimension_numbers<[1], [1], [0], [0], [0, 0, 1, 0], [], []>} : vector<16x8xf32>, vector<16x8xf32>, vector<16x16xf32> -> vector<16x16xf32>
    %cst_19 = arith.constant 0.353553385 : f32
    %37 = vector.broadcast %cst_19 : f32 to vector<16x16xf32>
    %38 = arith.mulf %36, %37 : vector<16x16xf32>
    %39 = arith.addf %38, %0 : vector<16x16xf32>
    %cst_20 = arith.constant dense<0xFF800000> : vector<16xf32>
    %40 = vector.multi_reduction <maximumf>, %39, %cst_20 [1] : vector<16x16xf32> to vector<16xf32>
    %41 = vector.shape_cast %40 : vector<16xf32> to vector<16x1xf32>
    %42 = vector.broadcast %41 : vector<16x1xf32> to vector<16x16xf32>
    %43 = arith.subf %39, %42 : vector<16x16xf32>
    %44 = math.exp %43 : vector<16x16xf32>
    %cst_21 = arith.constant dense<0.000000e+00> : vector<16xf32>
    %45 = vector.multi_reduction <add>, %44, %cst_21 [1] : vector<16x16xf32> to vector<16xf32>
    %46 = vector.shape_cast %45 : vector<16xf32> to vector<16x1xf32>
    %47 = tpu.reciprocal %46 {approx = true} : vector<16x1xf32> -> vector<16x1xf32>
    %48 = vector.broadcast %47 : vector<16x1xf32> to vector<16x16xf32>
    %49 = arith.mulf %44, %48 : vector<16x16xf32>
    %cst_22 = arith.constant dense<0.000000e+00> : vector<16x8xf32>
    %50 = tpu.matmul %49, %35, %cst_22 {dimension_numbers = #tpu.dot_dimension_numbers<[1], [0], [0], [1], [0, 0, 1, 1], [], []>} : vector<16x16xf32>, vector<16x8xf32>, vector<16x8xf32> -> vector<16x8xf32>
    %c0_23 = arith.constant 0 : index
    %c0_24 = arith.constant 0 : index
    %51 = vector.load %arg23[%c0_23, %c0_24] : memref<16x32xf32, #tpu.memory_space<vmem>>, vector<16x8xf32>
    tpu.vector_store %arg23[%c0_23, %c0_24], %50 {strides = array<i32>} : memref<16x32xf32, #tpu.memory_space<vmem>>, vector<16x8xf32>,
    %52 = vector.extract_strided_slice %32 {offsets = [0, 8], sizes = [16, 8], strides = [1, 1]} : vector<16x96xf32> to vector<16x8xf32>
    %53 = vector.extract_strided_slice %32 {offsets = [0, 40], sizes = [16, 8], strides = [1, 1]} : vector<16x96xf32> to vector<16x8xf32>
    %54 = vector.extract_strided_slice %32 {offsets = [0, 72], sizes = [16, 8], strides = [1, 1]} : vector<16x96xf32> to vector<16x8xf32>
    %cst_25 = arith.constant dense<0.000000e+00> : vector<16x16xf32>
    %55 = tpu.matmul %52, %53, %cst_25 {dimension_numbers = #tpu.dot_dimension_numbers<[1], [1], [0], [0], [0, 0, 1, 0], [], []>} : vector<16x8xf32>, vector<16x8xf32>, vector<16x16xf32> -> vector<16x16xf32>
    %cst_26 = arith.constant 0.353553385 : f32
    %56 = vector.broadcast %cst_26 : f32 to vector<16x16xf32>
    %57 = arith.mulf %55, %56 : vector<16x16xf32>
    %58 = arith.addf %57, %0 : vector<16x16xf32>
    %cst_27 = arith.constant dense<0xFF800000> : vector<16xf32>
    %59 = vector.multi_reduction <maximumf>, %58, %cst_27 [1] : vector<16x16xf32> to vector<16xf32>
    %60 = vector.shape_cast %59 : vector<16xf32> to vector<16x1xf32>
    %61 = vector.broadcast %60 : vector<16x1xf32> to vector<16x16xf32>
    %62 = arith.subf %58, %61 : vector<16x16xf32>
    %63 = math.exp %62 : vector<16x16xf32>
    %cst_28 = arith.constant dense<0.000000e+00> : vector<16xf32>
    %64 = vector.multi_reduction <add>, %63, %cst_28 [1] : vector<16x16xf32> to vector<16xf32>
    %65 = vector.shape_cast %64 : vector<16xf32> to vector<16x1xf32>
    %66 = tpu.reciprocal %65 {approx = true} : vector<16x1xf32> -> vector<16x1xf32>
    %67 = vector.broadcast %66 : vector<16x1xf32> to vector<16x16xf32>
    %68 = arith.mulf %63, %67 : vector<16x16xf32>
    %cst_29 = arith.constant dense<0.000000e+00> : vector<16x8xf32>
    %69 = tpu.matmul %68, %54, %cst_29 {dimension_numbers = #tpu.dot_dimension_numbers<[1], [0], [0], [1], [0, 0, 1, 1], [], []>} : vector<16x16xf32>, vector<16x8xf32>, vector<16x8xf32> -> vector<16x8xf32>
    %c0_30 = arith.constant 0 : index
    %c8 = arith.constant 8 : index
    %70 = vector.load %arg23[%c0_30, %c8] : memref<16x32xf32, #tpu.memory_space<vmem>>, vector<16x8xf32>
    tpu.vector_store %arg23[%c0_30, %c8], %69 {strides = array<i32>} : memref<16x32xf32, #tpu.memory_space<vmem>>, vector<16x8xf32>,
    %71 = vector.extract_strided_slice %32 {offsets = [0, 16], sizes = [16, 8], strides = [1, 1]} : vector<16x96xf32> to vector<16x8xf32>
    %72 = vector.extract_strided_slice %32 {offsets = [0, 48], sizes = [16, 8], strides = [1, 1]} : vector<16x96xf32> to vector<16x8xf32>
    %73 = vector.extract_strided_slice %32 {offsets = [0, 80], sizes = [16, 8], strides = [1, 1]} : vector<16x96xf32> to vector<16x8xf32>
    %cst_31 = arith.constant dense<0.000000e+00> : vector<16x16xf32>
    %74 = tpu.matmul %71, %72, %cst_31 {dimension_numbers = #tpu.dot_dimension_numbers<[1], [1], [0], [0], [0, 0, 1, 0], [], []>} : vector<16x8xf32>, vector<16x8xf32>, vector<16x16xf32> -> vector<16x16xf32>
    %cst_32 = arith.constant 0.353553385 : f32
    %75 = vector.broadcast %cst_32 : f32 to vector<16x16xf32>
    %76 = arith.mulf %74, %75 : vector<16x16xf32>
    %77 = arith.addf %76, %0 : vector<16x16xf32>
    %cst_33 = arith.constant dense<0xFF800000> : vector<16xf32>
    %78 = vector.multi_reduction <maximumf>, %77, %cst_33 [1] : vector<16x16xf32> to vector<16xf32>
    %79 = vector.shape_cast %78 : vector<16xf32> to vector<16x1xf32>
    %80 = vector.broadcast %79 : vector<16x1xf32> to vector<16x16xf32>
    %81 = arith.subf %77, %80 : vector<16x16xf32>
    %82 = math.exp %81 : vector<16x16xf32>
    %cst_34 = arith.constant dense<0.000000e+00> : vector<16xf32>
    %83 = vector.multi_reduction <add>, %82, %cst_34 [1] : vector<16x16xf32> to vector<16xf32>
    %84 = vector.shape_cast %83 : vector<16xf32> to vector<16x1xf32>
    %85 = tpu.reciprocal %84 {approx = true} : vector<16x1xf32> -> vector<16x1xf32>
    %86 = vector.broadcast %85 : vector<16x1xf32> to vector<16x16xf32>
    %87 = arith.mulf %82, %86 : vector<16x16xf32>
    %cst_35 = arith.constant dense<0.000000e+00> : vector<16x8xf32>
    %88 = tpu.matmul %87, %73, %cst_35 {dimension_numbers = #tpu.dot_dimension_numbers<[1], [0], [0], [1], [0, 0, 1, 1], [], []>} : vector<16x16xf32>, vector<16x8xf32>, vector<16x8xf32> -> vector<16x8xf32>
    %c0_36 = arith.constant 0 : index
    %c16 = arith.constant 16 : index
    %89 = vector.load %arg23[%c0_36, %c16] : memref<16x32xf32, #tpu.memory_space<vmem>>, vector<16x8xf32>
    tpu.vector_store %arg23[%c0_36, %c16], %88 {strides = array<i32>} : memref<16x32xf32, #tpu.memory_space<vmem>>, vector<16x8xf32>,
    %90 = vector.extract_strided_slice %32 {offsets = [0, 24], sizes = [16, 8], strides = [1, 1]} : vector<16x96xf32> to vector<16x8xf32>
    %91 = vector.extract_strided_slice %32 {offsets = [0, 56], sizes = [16, 8], strides = [1, 1]} : vector<16x96xf32> to vector<16x8xf32>
    %92 = vector.extract_strided_slice %32 {offsets = [0, 88], sizes = [16, 8], strides = [1, 1]} : vector<16x96xf32> to vector<16x8xf32>
    %cst_37 = arith.constant dense<0.000000e+00> : vector<16x16xf32>
    %93 = tpu.matmul %90, %91, %cst_37 {dimension_numbers = #tpu.dot_dimension_numbers<[1], [1], [0], [0], [0, 0, 1, 0], [], []>} : vector<16x8xf32>, vector<16x8xf32>, vector<16x16xf32> -> vector<16x16xf32>
    %cst_38 = arith.constant 0.353553385 : f32
    %94 = vector.broadcast %cst_38 : f32 to vector<16x16xf32>
    %95 = arith.mulf %93, %94 : vector<16x16xf32>
    %96 = arith.addf %95, %0 : vector<16x16xf32>
    %cst_39 = arith.constant dense<0xFF800000> : vector<16xf32>
    %97 = vector.multi_reduction <maximumf>, %96, %cst_39 [1] : vector<16x16xf32> to vector<16xf32>
    %98 = vector.shape_cast %97 : vector<16xf32> to vector<16x1xf32>
    %99 = vector.broadcast %98 : vector<16x1xf32> to vector<16x16xf32>
    %100 = arith.subf %96, %99 : vector<16x16xf32>
    %101 = math.exp %100 : vector<16x16xf32>
    %cst_40 = arith.constant dense<0.000000e+00> : vector<16xf32>
    %102 = vector.multi_reduction <add>, %101, %cst_40 [1] : vector<16x16xf32> to vector<16xf32>
    %103 = vector.shape_cast %102 : vector<16xf32> to vector<16x1xf32>
    %104 = tpu.reciprocal %103 {approx = true} : vector<16x1xf32> -> vector<16x1xf32>
    %105 = vector.broadcast %104 : vector<16x1xf32> to vector<16x16xf32>
    %106 = arith.mulf %101, %105 : vector<16x16xf32>
    %cst_41 = arith.constant dense<0.000000e+00> : vector<16x8xf32>
    %107 = tpu.matmul %106, %92, %cst_41 {dimension_numbers = #tpu.dot_dimension_numbers<[1], [0], [0], [1], [0, 0, 1, 1], [], []>} : vector<16x16xf32>, vector<16x8xf32>, vector<16x8xf32> -> vector<16x8xf32>
    %c0_42 = arith.constant 0 : index
    %c24 = arith.constant 24 : index
    %108 = vector.load %arg23[%c0_42, %c24] : memref<16x32xf32, #tpu.memory_space<vmem>>, vector<16x8xf32>
    tpu.vector_store %arg23[%c0_42, %c24], %107 {strides = array<i32>} : memref<16x32xf32, #tpu.memory_space<vmem>>, vector<16x8xf32>,
    %c0_43 = arith.constant 0 : index
    %c0_44 = arith.constant 0 : index
    %109 = vector.load %arg23[%c0_43, %c0_44] : memref<16x32xf32, #tpu.memory_space<vmem>>, vector<16x32xf32>
    %c0_45 = arith.constant 0 : index
    %c0_46 = arith.constant 0 : index
    %c0_47 = arith.constant 0 : index
    %110 = vector.load %arg7[%c0_45, %c0_46, %c0_47] : memref<2x32x32xf32, #tpu.memory_space<vmem>>, vector<1x32x32xf32>
    %111 = vector.shape_cast %110 : vector<1x32x32xf32> to vector<32x32xf32>
    %cst_48 = arith.constant dense<0.000000e+00> : vector<16x32xf32>
    %112 = tpu.matmul %109, %111, %cst_48 {dimension_numbers = #tpu.dot_dimension_numbers<[1], [0], [0], [1], [0, 0, 1, 1], [], []>} : vector<16x32xf32>, vector<32x32xf32>, vector<16x32xf32> -> vector<16x32xf32>
    %c0_49 = arith.constant 0 : index
    %c0_50 = arith.constant 0 : index
    %c0_51 = arith.constant 0 : index
    %113 = vector.load %arg8[%c0_49, %c0_50, %c0_51] : memref<2x1x32xf32, #tpu.memory_space<vmem>>, vector<1x1x32xf32>
    %114 = vector.shape_cast %113 : vector<1x1x32xf32> to vector<1x32xf32>
    %115 = vector.broadcast %114 : vector<1x32xf32> to vector<16x32xf32>
    %116 = arith.addf %112, %115 : vector<16x32xf32>
    %117 = arith.addf %116, %25 : vector<16x32xf32>
    %c0_52 = arith.constant 0 : index
    %c0_53 = arith.constant 0 : index
    %c0_54 = arith.constant 0 : index
    %118 = vector.load %arg9[%c0_52, %c0_53, %c0_54] : memref<2x1x32xf32, #tpu.memory_space<vmem>>, vector<1x1x32xf32>
    %119 = vector.shape_cast %118 : vector<1x1x32xf32> to vector<1x32xf32>
    %c0_55 = arith.constant 0 : index
    %c0_56 = arith.constant 0 : index
    %c0_57 = arith.constant 0 : index
    %120 = vector.load %arg10[%c0_55, %c0_56, %c0_57] : memref<2x1x32xf32, #tpu.memory_space<vmem>>, vector<1x1x32xf32>
    %121 = vector.shape_cast %120 : vector<1x1x32xf32> to vector<1x32xf32>
    %cst_58 = arith.constant dense<0.000000e+00> : vector<16xf32>
    %122 = vector.multi_reduction <add>, %117, %cst_58 [1] : vector<16x32xf32> to vector<16xf32>
    %123 = vector.shape_cast %122 : vector<16xf32> to vector<16x1xf32>
    %cst_59 = arith.constant 3.200000e+01 : f32
    %124 = vector.broadcast %cst_59 : f32 to vector<16x1xf32>
    %125 = arith.divf %123, %124 : vector<16x1xf32>
    %126 = vector.broadcast %125 : vector<16x1xf32> to vector<16x32xf32>
    %127 = arith.subf %117, %126 : vector<16x32xf32>
    %128 = arith.mulf %127, %127 : vector<16x32xf32>
    %cst_60 = arith.constant dense<0.000000e+00> : vector<16xf32>
    %129 = vector.multi_reduction <add>, %128, %cst_60 [1] : vector<16x32xf32> to vector<16xf32>
    %130 = vector.shape_cast %129 : vector<16xf32> to vector<16x1xf32>
    %cst_61 = arith.constant 3.200000e+01 : f32
    %131 = vector.broadcast %cst_61 : f32 to vector<16x1xf32>
    %132 = arith.divf %130, %131 : vector<16x1xf32>
    %133 = vector.broadcast %125 : vector<16x1xf32> to vector<16x32xf32>
    %134 = arith.subf %117, %133 : vector<16x32xf32>
    %cst_62 = arith.constant 9.99999996E-13 : f32
    %135 = vector.broadcast %cst_62 : f32 to vector<16x1xf32>
    %136 = arith.addf %132, %135 : vector<16x1xf32>
    %137 = math.rsqrt %136 : vector<16x1xf32>
    %138 = vector.broadcast %137 : vector<16x1xf32> to vector<16x32xf32>
    %139 = arith.mulf %134, %138 : vector<16x32xf32>
    %140 = vector.broadcast %119 : vector<1x32xf32> to vector<16x32xf32>
    %141 = arith.mulf %139, %140 : vector<16x32xf32>
    %142 = vector.broadcast %121 : vector<1x32xf32> to vector<16x32xf32>
    %143 = arith.addf %141, %142 : vector<16x32xf32>
    %c0_63 = arith.constant 0 : index
    %c0_64 = arith.constant 0 : index
    %c0_65 = arith.constant 0 : index
    %144 = vector.load %arg11[%c0_63, %c0_64, %c0_65] : memref<2x32x64xf32, #tpu.memory_space<vmem>>, vector<1x32x64xf32>
    %145 = vector.shape_cast %144 : vector<1x32x64xf32> to vector<32x64xf32>
    %cst_66 = arith.constant dense<0.000000e+00> : vector<16x64xf32>
    %146 = tpu.matmul %143, %145, %cst_66 {dimension_numbers = #tpu.dot_dimension_numbers<[1], [0], [0], [1], [0, 0, 1, 1], [], []>} : vector<16x32xf32>, vector<32x64xf32>, vector<16x64xf32> -> vector<16x64xf32>
    %c0_67 = arith.constant 0 : index
    %c0_68 = arith.constant 0 : index
    %c0_69 = arith.constant 0 : index
    %147 = vector.load %arg12[%c0_67, %c0_68, %c0_69] : memref<2x1x64xf32, #tpu.memory_space<vmem>>, vector<1x1x64xf32>
    %148 = vector.shape_cast %147 : vector<1x1x64xf32> to vector<1x64xf32>
    %149 = vector.broadcast %148 : vector<1x64xf32> to vector<16x64xf32>
    %150 = arith.addf %146, %149 : vector<16x64xf32>
    %cst_70 = arith.constant 5.000000e-01 : f32
    %151 = vector.broadcast %cst_70 : f32 to vector<16x64xf32>
    %152 = arith.mulf %151, %150 : vector<16x64xf32>
    %cst_71 = arith.constant 4.471500e-02 : f32
    %153 = vector.broadcast %cst_71 : f32 to vector<16x64xf32>
    %154 = arith.mulf %153, %150 : vector<16x64xf32>
    %155 = arith.mulf %154, %150 : vector<16x64xf32>
    %156 = arith.mulf %155, %150 : vector<16x64xf32>
    %157 = arith.addf %150, %156 : vector<16x64xf32>
    %cst_72 = arith.constant 0.797884583 : f32
    %158 = vector.broadcast %cst_72 : f32 to vector<16x64xf32>
    %159 = arith.mulf %158, %157 : vector<16x64xf32>
    %160 = math.tanh %159 : vector<16x64xf32>
    %cst_73 = arith.constant 1.000000e+00 : f32
    %161 = vector.broadcast %cst_73 : f32 to vector<16x64xf32>
    %162 = arith.addf %161, %160 : vector<16x64xf32>
    %163 = arith.mulf %152, %162 : vector<16x64xf32>
    %c0_74 = arith.constant 0 : index
    %c0_75 = arith.constant 0 : index
    %c0_76 = arith.constant 0 : index
    %164 = vector.load %arg13[%c0_74, %c0_75, %c0_76] : memref<2x64x32xf32, #tpu.memory_space<vmem>>, vector<1x64x32xf32>
    %165 = vector.shape_cast %164 : vector<1x64x32xf32> to vector<64x32xf32>
    %cst_77 = arith.constant dense<0.000000e+00> : vector<16x32xf32>
    %166 = tpu.matmul %163, %165, %cst_77 {dimension_numbers = #tpu.dot_dimension_numbers<[1], [0], [0], [1], [0, 0, 1, 1], [], []>} : vector<16x64xf32>, vector<64x32xf32>, vector<16x32xf32> -> vector<16x32xf32>
    %c0_78 = arith.constant 0 : index
    %c0_79 = arith.constant 0 : index
    %c0_80 = arith.constant 0 : index
    %167 = vector.load %arg14[%c0_78, %c0_79, %c0_80] : memref<2x1x32xf32, #tpu.memory_space<vmem>>, vector<1x1x32xf32>
    %168 = vector.shape_cast %167 : vector<1x1x32xf32> to vector<1x32xf32>
    %169 = vector.broadcast %168 : vector<1x32xf32> to vector<16x32xf32>
    %170 = arith.addf %166, %169 : vector<16x32xf32>
    %171 = arith.addf %170, %143 : vector<16x32xf32>
    %c0_81 = arith.constant 0 : index
    %c0_82 = arith.constant 0 : index
    %c0_83 = arith.constant 0 : index
    %172 = vector.load %arg15[%c0_81, %c0_82, %c0_83] : memref<2x1x32xf32, #tpu.memory_space<vmem>>, vector<1x1x32xf32>
    %173 = vector.shape_cast %172 : vector<1x1x32xf32> to vector<1x32xf32>
    %c0_84 = arith.constant 0 : index
    %c0_85 = arith.constant 0 : index
    %c0_86 = arith.constant 0 : index
    %174 = vector.load %arg16[%c0_84, %c0_85, %c0_86] : memref<2x1x32xf32, #tpu.memory_space<vmem>>, vector<1x1x32xf32>
    %175 = vector.shape_cast %174 : vector<1x1x32xf32> to vector<1x32xf32>
    %cst_87 = arith.constant dense<0.000000e+00> : vector<16xf32>
    %176 = vector.multi_reduction <add>, %171, %cst_87 [1] : vector<16x32xf32> to vector<16xf32>
    %177 = vector.shape_cast %176 : vector<16xf32> to vector<16x1xf32>
    %cst_88 = arith.constant 3.200000e+01 : f32
    %178 = vector.broadcast %cst_88 : f32 to vector<16x1xf32>
    %179 = arith.divf %177, %178 : vector<16x1xf32>
    %180 = vector.broadcast %179 : vector<16x1xf32> to vector<16x32xf32>
    %181 = arith.subf %171, %180 : vector<16x32xf32>
    %182 = arith.mulf %181, %181 : vector<16x32xf32>
    %cst_89 = arith.constant dense<0.000000e+00> : vector<16xf32>
    %183 = vector.multi_reduction <add>, %182, %cst_89 [1] : vector<16x32xf32> to vector<16xf32>
    %184 = vector.shape_cast %183 : vector<16xf32> to vector<16x1xf32>
    %cst_90 = arith.constant 3.200000e+01 : f32
    %185 = vector.broadcast %cst_90 : f32 to vector<16x1xf32>
    %186 = arith.divf %184, %185 : vector<16x1xf32>
    %187 = vector.broadcast %179 : vector<16x1xf32> to vector<16x32xf32>
    %188 = arith.subf %171, %187 : vector<16x32xf32>
    %cst_91 = arith.constant 9.99999996E-13 : f32
    %189 = vector.broadcast %cst_91 : f32 to vector<16x1xf32>
    %190 = arith.addf %186, %189 : vector<16x1xf32>
    %191 = math.rsqrt %190 : vector<16x1xf32>
    %192 = vector.broadcast %191 : vector<16x1xf32> to vector<16x32xf32>
    %193 = arith.mulf %188, %192 : vector<16x32xf32>
    %194 = vector.broadcast %173 : vector<1x32xf32> to vector<16x32xf32>
    %195 = arith.mulf %193, %194 : vector<16x32xf32>
    %196 = vector.broadcast %175 : vector<1x32xf32> to vector<16x32xf32>
    %197 = arith.addf %195, %196 : vector<16x32xf32>
    %c1 = arith.constant 1 : index
    %c0_92 = arith.constant 0 : index
    %c0_93 = arith.constant 0 : index
    %198 = vector.load %arg5[%c1, %c0_92, %c0_93] : memref<2x32x96xf32, #tpu.memory_space<vmem>>, vector<1x32x96xf32>
    %199 = vector.shape_cast %198 : vector<1x32x96xf32> to vector<32x96xf32>
    %cst_94 = arith.constant dense<0.000000e+00> : vector<16x96xf32>
    %200 = tpu.matmul %197, %199, %cst_94 {dimension_numbers = #tpu.dot_dimension_numbers<[1], [0], [0], [1], [0, 0, 1, 1], [], []>} : vector<16x32xf32>, vector<32x96xf32>, vector<16x96xf32> -> vector<16x96xf32>
    %c1_95 = arith.constant 1 : index
    %c0_96 = arith.constant 0 : index
    %c0_97 = arith.constant 0 : index
    %201 = vector.load %arg6[%c1_95, %c0_96, %c0_97] : memref<2x1x96xf32, #tpu.memory_space<vmem>>, vector<1x1x96xf32>
    %202 = vector.shape_cast %201 : vector<1x1x96xf32> to vector<1x96xf32>
    %203 = vector.broadcast %202 : vector<1x96xf32> to vector<16x96xf32>
    %204 = arith.addf %200, %203 : vector<16x96xf32>
    %205 = vector.extract_strided_slice %204 {offsets = [0, 0], sizes = [16, 8], strides = [1, 1]} : vector<16x96xf32> to vector<16x8xf32>
    %206 = vector.extract_strided_slice %204 {offsets = [0, 32], sizes = [16, 8], strides = [1, 1]} : vector<16x96xf32> to vector<16x8xf32>
    %207 = vector.extract_strided_slice %204 {offsets = [0, 64], sizes = [16, 8], strides = [1, 1]} : vector<16x96xf32> to vector<16x8xf32>
    %cst_98 = arith.constant dense<0.000000e+00> : vector<16x16xf32>
    %208 = tpu.matmul %205, %206, %cst_98 {dimension_numbers = #tpu.dot_dimension_numbers<[1], [1], [0], [0], [0, 0, 1, 0], [], []>} : vector<16x8xf32>, vector<16x8xf32>, vector<16x16xf32> -> vector<16x16xf32>
    %cst_99 = arith.constant 0.353553385 : f32
    %209 = vector.broadcast %cst_99 : f32 to vector<16x16xf32>
    %210 = arith.mulf %208, %209 : vector<16x16xf32>
    %211 = arith.addf %210, %0 : vector<16x16xf32>
    %cst_100 = arith.constant dense<0xFF800000> : vector<16xf32>
    %212 = vector.multi_reduction <maximumf>, %211, %cst_100 [1] : vector<16x16xf32> to vector<16xf32>
    %213 = vector.shape_cast %212 : vector<16xf32> to vector<16x1xf32>
    %214 = vector.broadcast %213 : vector<16x1xf32> to vector<16x16xf32>
    %215 = arith.subf %211, %214 : vector<16x16xf32>
    %216 = math.exp %215 : vector<16x16xf32>
    %cst_101 = arith.constant dense<0.000000e+00> : vector<16xf32>
    %217 = vector.multi_reduction <add>, %216, %cst_101 [1] : vector<16x16xf32> to vector<16xf32>
    %218 = vector.shape_cast %217 : vector<16xf32> to vector<16x1xf32>
    %219 = tpu.reciprocal %218 {approx = true} : vector<16x1xf32> -> vector<16x1xf32>
    %220 = vector.broadcast %219 : vector<16x1xf32> to vector<16x16xf32>
    %221 = arith.mulf %216, %220 : vector<16x16xf32>
    %cst_102 = arith.constant dense<0.000000e+00> : vector<16x8xf32>
    %222 = tpu.matmul %221, %207, %cst_102 {dimension_numbers = #tpu.dot_dimension_numbers<[1], [0], [0], [1], [0, 0, 1, 1], [], []>} : vector<16x16xf32>, vector<16x8xf32>, vector<16x8xf32> -> vector<16x8xf32>
    %c0_103 = arith.constant 0 : index
    %c0_104 = arith.constant 0 : index
    %223 = vector.load %arg23[%c0_103, %c0_104] : memref<16x32xf32, #tpu.memory_space<vmem>>, vector<16x8xf32>
    tpu.vector_store %arg23[%c0_103, %c0_104], %222 {strides = array<i32>} : memref<16x32xf32, #tpu.memory_space<vmem>>, vector<16x8xf32>,
    %224 = vector.extract_strided_slice %204 {offsets = [0, 8], sizes = [16, 8], strides = [1, 1]} : vector<16x96xf32> to vector<16x8xf32>
    %225 = vector.extract_strided_slice %204 {offsets = [0, 40], sizes = [16, 8], strides = [1, 1]} : vector<16x96xf32> to vector<16x8xf32>
    %226 = vector.extract_strided_slice %204 {offsets = [0, 72], sizes = [16, 8], strides = [1, 1]} : vector<16x96xf32> to vector<16x8xf32>
    %cst_105 = arith.constant dense<0.000000e+00> : vector<16x16xf32>
    %227 = tpu.matmul %224, %225, %cst_105 {dimension_numbers = #tpu.dot_dimension_numbers<[1], [1], [0], [0], [0, 0, 1, 0], [], []>} : vector<16x8xf32>, vector<16x8xf32>, vector<16x16xf32> -> vector<16x16xf32>
    %cst_106 = arith.constant 0.353553385 : f32
    %228 = vector.broadcast %cst_106 : f32 to vector<16x16xf32>
    %229 = arith.mulf %227, %228 : vector<16x16xf32>
    %230 = arith.addf %229, %0 : vector<16x16xf32>
    %cst_107 = arith.constant dense<0xFF800000> : vector<16xf32>
    %231 = vector.multi_reduction <maximumf>, %230, %cst_107 [1] : vector<16x16xf32> to vector<16xf32>
    %232 = vector.shape_cast %231 : vector<16xf32> to vector<16x1xf32>
    %233 = vector.broadcast %232 : vector<16x1xf32> to vector<16x16xf32>
    %234 = arith.subf %230, %233 : vector<16x16xf32>
    %235 = math.exp %234 : vector<16x16xf32>
    %cst_108 = arith.constant dense<0.000000e+00> : vector<16xf32>
    %236 = vector.multi_reduction <add>, %235, %cst_108 [1] : vector<16x16xf32> to vector<16xf32>
    %237 = vector.shape_cast %236 : vector<16xf32> to vector<16x1xf32>
    %238 = tpu.reciprocal %237 {approx = true} : vector<16x1xf32> -> vector<16x1xf32>
    %239 = vector.broadcast %238 : vector<16x1xf32> to vector<16x16xf32>
    %240 = arith.mulf %235, %239 : vector<16x16xf32>
    %cst_109 = arith.constant dense<0.000000e+00> : vector<16x8xf32>
    %241 = tpu.matmul %240, %226, %cst_109 {dimension_numbers = #tpu.dot_dimension_numbers<[1], [0], [0], [1], [0, 0, 1, 1], [], []>} : vector<16x16xf32>, vector<16x8xf32>, vector<16x8xf32> -> vector<16x8xf32>
    %c0_110 = arith.constant 0 : index
    %c8_111 = arith.constant 8 : index
    %242 = vector.load %arg23[%c0_110, %c8_111] : memref<16x32xf32, #tpu.memory_space<vmem>>, vector<16x8xf32>
    tpu.vector_store %arg23[%c0_110, %c8_111], %241 {strides = array<i32>} : memref<16x32xf32, #tpu.memory_space<vmem>>, vector<16x8xf32>,
    %243 = vector.extract_strided_slice %204 {offsets = [0, 16], sizes = [16, 8], strides = [1, 1]} : vector<16x96xf32> to vector<16x8xf32>
    %244 = vector.extract_strided_slice %204 {offsets = [0, 48], sizes = [16, 8], strides = [1, 1]} : vector<16x96xf32> to vector<16x8xf32>
    %245 = vector.extract_strided_slice %204 {offsets = [0, 80], sizes = [16, 8], strides = [1, 1]} : vector<16x96xf32> to vector<16x8xf32>
    %cst_112 = arith.constant dense<0.000000e+00> : vector<16x16xf32>
    %246 = tpu.matmul %243, %244, %cst_112 {dimension_numbers = #tpu.dot_dimension_numbers<[1], [1], [0], [0], [0, 0, 1, 0], [], []>} : vector<16x8xf32>, vector<16x8xf32>, vector<16x16xf32> -> vector<16x16xf32>
    %cst_113 = arith.constant 0.353553385 : f32
    %247 = vector.broadcast %cst_113 : f32 to vector<16x16xf32>
    %248 = arith.mulf %246, %247 : vector<16x16xf32>
    %249 = arith.addf %248, %0 : vector<16x16xf32>
    %cst_114 = arith.constant dense<0xFF800000> : vector<16xf32>
    %250 = vector.multi_reduction <maximumf>, %249, %cst_114 [1] : vector<16x16xf32> to vector<16xf32>
    %251 = vector.shape_cast %250 : vector<16xf32> to vector<16x1xf32>
    %252 = vector.broadcast %251 : vector<16x1xf32> to vector<16x16xf32>
    %253 = arith.subf %249, %252 : vector<16x16xf32>
    %254 = math.exp %253 : vector<16x16xf32>
    %cst_115 = arith.constant dense<0.000000e+00> : vector<16xf32>
    %255 = vector.multi_reduction <add>, %254, %cst_115 [1] : vector<16x16xf32> to vector<16xf32>
    %256 = vector.shape_cast %255 : vector<16xf32> to vector<16x1xf32>
    %257 = tpu.reciprocal %256 {approx = true} : vector<16x1xf32> -> vector<16x1xf32>
    %258 = vector.broadcast %257 : vector<16x1xf32> to vector<16x16xf32>
    %259 = arith.mulf %254, %258 : vector<16x16xf32>
    %cst_116 = arith.constant dense<0.000000e+00> : vector<16x8xf32>
    %260 = tpu.matmul %259, %245, %cst_116 {dimension_numbers = #tpu.dot_dimension_numbers<[1], [0], [0], [1], [0, 0, 1, 1], [], []>} : vector<16x16xf32>, vector<16x8xf32>, vector<16x8xf32> -> vector<16x8xf32>
    %c0_117 = arith.constant 0 : index
    %c16_118 = arith.constant 16 : index
    %261 = vector.load %arg23[%c0_117, %c16_118] : memref<16x32xf32, #tpu.memory_space<vmem>>, vector<16x8xf32>
    tpu.vector_store %arg23[%c0_117, %c16_118], %260 {strides = array<i32>} : memref<16x32xf32, #tpu.memory_space<vmem>>, vector<16x8xf32>,
    %262 = vector.extract_strided_slice %204 {offsets = [0, 24], sizes = [16, 8], strides = [1, 1]} : vector<16x96xf32> to vector<16x8xf32>
    %263 = vector.extract_strided_slice %204 {offsets = [0, 56], sizes = [16, 8], strides = [1, 1]} : vector<16x96xf32> to vector<16x8xf32>
    %264 = vector.extract_strided_slice %204 {offsets = [0, 88], sizes = [16, 8], strides = [1, 1]} : vector<16x96xf32> to vector<16x8xf32>
    %cst_119 = arith.constant dense<0.000000e+00> : vector<16x16xf32>
    %265 = tpu.matmul %262, %263, %cst_119 {dimension_numbers = #tpu.dot_dimension_numbers<[1], [1], [0], [0], [0, 0, 1, 0], [], []>} : vector<16x8xf32>, vector<16x8xf32>, vector<16x16xf32> -> vector<16x16xf32>
    %cst_120 = arith.constant 0.353553385 : f32
    %266 = vector.broadcast %cst_120 : f32 to vector<16x16xf32>
    %267 = arith.mulf %265, %266 : vector<16x16xf32>
    %268 = arith.addf %267, %0 : vector<16x16xf32>
    %cst_121 = arith.constant dense<0xFF800000> : vector<16xf32>
    %269 = vector.multi_reduction <maximumf>, %268, %cst_121 [1] : vector<16x16xf32> to vector<16xf32>
    %270 = vector.shape_cast %269 : vector<16xf32> to vector<16x1xf32>
    %271 = vector.broadcast %270 : vector<16x1xf32> to vector<16x16xf32>
    %272 = arith.subf %268, %271 : vector<16x16xf32>
    %273 = math.exp %272 : vector<16x16xf32>
    %cst_122 = arith.constant dense<0.000000e+00> : vector<16xf32>
    %274 = vector.multi_reduction <add>, %273, %cst_122 [1] : vector<16x16xf32> to vector<16xf32>
    %275 = vector.shape_cast %274 : vector<16xf32> to vector<16x1xf32>
    %276 = tpu.reciprocal %275 {approx = true} : vector<16x1xf32> -> vector<16x1xf32>
    %277 = vector.broadcast %276 : vector<16x1xf32> to vector<16x16xf32>
    %278 = arith.mulf %273, %277 : vector<16x16xf32>
    %cst_123 = arith.constant dense<0.000000e+00> : vector<16x8xf32>
    %279 = tpu.matmul %278, %264, %cst_123 {dimension_numbers = #tpu.dot_dimension_numbers<[1], [0], [0], [1], [0, 0, 1, 1], [], []>} : vector<16x16xf32>, vector<16x8xf32>, vector<16x8xf32> -> vector<16x8xf32>
    %c0_124 = arith.constant 0 : index
    %c24_125 = arith.constant 24 : index
    %280 = vector.load %arg23[%c0_124, %c24_125] : memref<16x32xf32, #tpu.memory_space<vmem>>, vector<16x8xf32>
    tpu.vector_store %arg23[%c0_124, %c24_125], %279 {strides = array<i32>} : memref<16x32xf32, #tpu.memory_space<vmem>>, vector<16x8xf32>,
    %c0_126 = arith.constant 0 : index
    %c0_127 = arith.constant 0 : index
    %281 = vector.load %arg23[%c0_126, %c0_127] : memref<16x32xf32, #tpu.memory_space<vmem>>, vector<16x32xf32>
    %c1_128 = arith.constant 1 : index
    %c0_129 = arith.constant 0 : index
    %c0_130 = arith.constant 0 : index
    %282 = vector.load %arg7[%c1_128, %c0_129, %c0_130] : memref<2x32x32xf32, #tpu.memory_space<vmem>>, vector<1x32x32xf32>
    %283 = vector.shape_cast %282 : vector<1x32x32xf32> to vector<32x32xf32>
    %cst_131 = arith.constant dense<0.000000e+00> : vector<16x32xf32>
    %284 = tpu.matmul %281, %283, %cst_131 {dimension_numbers = #tpu.dot_dimension_numbers<[1], [0], [0], [1], [0, 0, 1, 1], [], []>} : vector<16x32xf32>, vector<32x32xf32>, vector<16x32xf32> -> vector<16x32xf32>
    %c1_132 = arith.constant 1 : index
    %c0_133 = arith.constant 0 : index
    %c0_134 = arith.constant 0 : index
    %285 = vector.load %arg8[%c1_132, %c0_133, %c0_134] : memref<2x1x32xf32, #tpu.memory_space<vmem>>, vector<1x1x32xf32>
    %286 = vector.shape_cast %285 : vector<1x1x32xf32> to vector<1x32xf32>
    %287 = vector.broadcast %286 : vector<1x32xf32> to vector<16x32xf32>
    %288 = arith.addf %284, %287 : vector<16x32xf32>
    %289 = arith.addf %288, %197 : vector<16x32xf32>
    %c1_135 = arith.constant 1 : index
    %c0_136 = arith.constant 0 : index
    %c0_137 = arith.constant 0 : index
    %290 = vector.load %arg9[%c1_135, %c0_136, %c0_137] : memref<2x1x32xf32, #tpu.memory_space<vmem>>, vector<1x1x32xf32>
    %291 = vector.shape_cast %290 : vector<1x1x32xf32> to vector<1x32xf32>
    %c1_138 = arith.constant 1 : index
    %c0_139 = arith.constant 0 : index
    %c0_140 = arith.constant 0 : index
    %292 = vector.load %arg10[%c1_138, %c0_139, %c0_140] : memref<2x1x32xf32, #tpu.memory_space<vmem>>, vector<1x1x32xf32>
    %293 = vector.shape_cast %292 : vector<1x1x32xf32> to vector<1x32xf32>
    %cst_141 = arith.constant dense<0.000000e+00> : vector<16xf32>
    %294 = vector.multi_reduction <add>, %289, %cst_141 [1] : vector<16x32xf32> to vector<16xf32>
    %295 = vector.shape_cast %294 : vector<16xf32> to vector<16x1xf32>
    %cst_142 = arith.constant 3.200000e+01 : f32
    %296 = vector.broadcast %cst_142 : f32 to vector<16x1xf32>
    %297 = arith.divf %295, %296 : vector<16x1xf32>
    %298 = vector.broadcast %297 : vector<16x1xf32> to vector<16x32xf32>
    %299 = arith.subf %289, %298 : vector<16x32xf32>
    %300 = arith.mulf %299, %299 : vector<16x32xf32>
    %cst_143 = arith.constant dense<0.000000e+00> : vector<16xf32>
    %301 = vector.multi_reduction <add>, %300, %cst_143 [1] : vector<16x32xf32> to vector<16xf32>
    %302 = vector.shape_cast %301 : vector<16xf32> to vector<16x1xf32>
    %cst_144 = arith.constant 3.200000e+01 : f32
    %303 = vector.broadcast %cst_144 : f32 to vector<16x1xf32>
    %304 = arith.divf %302, %303 : vector<16x1xf32>
    %305 = vector.broadcast %297 : vector<16x1xf32> to vector<16x32xf32>
    %306 = arith.subf %289, %305 : vector<16x32xf32>
    %cst_145 = arith.constant 9.99999996E-13 : f32
    %307 = vector.broadcast %cst_145 : f32 to vector<16x1xf32>
    %308 = arith.addf %304, %307 : vector<16x1xf32>
    %309 = math.rsqrt %308 : vector<16x1xf32>
    %310 = vector.broadcast %309 : vector<16x1xf32> to vector<16x32xf32>
    %311 = arith.mulf %306, %310 : vector<16x32xf32>
    %312 = vector.broadcast %291 : vector<1x32xf32> to vector<16x32xf32>
    %313 = arith.mulf %311, %312 : vector<16x32xf32>
    %314 = vector.broadcast %293 : vector<1x32xf32> to vector<16x32xf32>
    %315 = arith.addf %313, %314 : vector<16x32xf32>
    %c1_146 = arith.constant 1 : index
    %c0_147 = arith.constant 0 : index
    %c0_148 = arith.constant 0 : index
    %316 = vector.load %arg11[%c1_146, %c0_147, %c0_148] : memref<2x32x64xf32, #tpu.memory_space<vmem>>, vector<1x32x64xf32>
    %317 = vector.shape_cast %316 : vector<1x32x64xf32> to vector<32x64xf32>
    %cst_149 = arith.constant dense<0.000000e+00> : vector<16x64xf32>
    %318 = tpu.matmul %315, %317, %cst_149 {dimension_numbers = #tpu.dot_dimension_numbers<[1], [0], [0], [1], [0, 0, 1, 1], [], []>} : vector<16x32xf32>, vector<32x64xf32>, vector<16x64xf32> -> vector<16x64xf32>
    %c1_150 = arith.constant 1 : index
    %c0_151 = arith.constant 0 : index
    %c0_152 = arith.constant 0 : index
    %319 = vector.load %arg12[%c1_150, %c0_151, %c0_152] : memref<2x1x64xf32, #tpu.memory_space<vmem>>, vector<1x1x64xf32>
    %320 = vector.shape_cast %319 : vector<1x1x64xf32> to vector<1x64xf32>
    %321 = vector.broadcast %320 : vector<1x64xf32> to vector<16x64xf32>
    %322 = arith.addf %318, %321 : vector<16x64xf32>
    %cst_153 = arith.constant 5.000000e-01 : f32
    %323 = vector.broadcast %cst_153 : f32 to vector<16x64xf32>
    %324 = arith.mulf %323, %322 : vector<16x64xf32>
    %cst_154 = arith.constant 4.471500e-02 : f32
    %325 = vector.broadcast %cst_154 : f32 to vector<16x64xf32>
    %326 = arith.mulf %325, %322 : vector<16x64xf32>
    %327 = arith.mulf %326, %322 : vector<16x64xf32>
    %328 = arith.mulf %327, %322 : vector<16x64xf32>
    %329 = arith.addf %322, %328 : vector<16x64xf32>
    %cst_155 = arith.constant 0.797884583 : f32
    %330 = vector.broadcast %cst_155 : f32 to vector<16x64xf32>
    %331 = arith.mulf %330, %329 : vector<16x64xf32>
    %332 = math.tanh %331 : vector<16x64xf32>
    %cst_156 = arith.constant 1.000000e+00 : f32
    %333 = vector.broadcast %cst_156 : f32 to vector<16x64xf32>
    %334 = arith.addf %333, %332 : vector<16x64xf32>
    %335 = arith.mulf %324, %334 : vector<16x64xf32>
    %c1_157 = arith.constant 1 : index
    %c0_158 = arith.constant 0 : index
    %c0_159 = arith.constant 0 : index
    %336 = vector.load %arg13[%c1_157, %c0_158, %c0_159] : memref<2x64x32xf32, #tpu.memory_space<vmem>>, vector<1x64x32xf32>
    %337 = vector.shape_cast %336 : vector<1x64x32xf32> to vector<64x32xf32>
    %cst_160 = arith.constant dense<0.000000e+00> : vector<16x32xf32>
    %338 = tpu.matmul %335, %337, %cst_160 {dimension_numbers = #tpu.dot_dimension_numbers<[1], [0], [0], [1], [0, 0, 1, 1], [], []>} : vector<16x64xf32>, vector<64x32xf32>, vector<16x32xf32> -> vector<16x32xf32>
    %c1_161 = arith.constant 1 : index
    %c0_162 = arith.constant 0 : index
    %c0_163 = arith.constant 0 : index
    %339 = vector.load %arg14[%c1_161, %c0_162, %c0_163] : memref<2x1x32xf32, #tpu.memory_space<vmem>>, vector<1x1x32xf32>
    %340 = vector.shape_cast %339 : vector<1x1x32xf32> to vector<1x32xf32>
    %341 = vector.broadcast %340 : vector<1x32xf32> to vector<16x32xf32>
    %342 = arith.addf %338, %341 : vector<16x32xf32>
    %343 = arith.addf %342, %315 : vector<16x32xf32>
    %c1_164 = arith.constant 1 : index
    %c0_165 = arith.constant 0 : index
    %c0_166 = arith.constant 0 : index
    %344 = vector.load %arg15[%c1_164, %c0_165, %c0_166] : memref<2x1x32xf32, #tpu.memory_space<vmem>>, vector<1x1x32xf32>
    %345 = vector.shape_cast %344 : vector<1x1x32xf32> to vector<1x32xf32>
    %c1_167 = arith.constant 1 : index
    %c0_168 = arith.constant 0 : index
    %c0_169 = arith.constant 0 : index
    %346 = vector.load %arg16[%c1_167, %c0_168, %c0_169] : memref<2x1x32xf32, #tpu.memory_space<vmem>>, vector<1x1x32xf32>
    %347 = vector.shape_cast %346 : vector<1x1x32xf32> to vector<1x32xf32>
    %cst_170 = arith.constant dense<0.000000e+00> : vector<16xf32>
    %348 = vector.multi_reduction <add>, %343, %cst_170 [1] : vector<16x32xf32> to vector<16xf32>
    %349 = vector.shape_cast %348 : vector<16xf32> to vector<16x1xf32>
    %cst_171 = arith.constant 3.200000e+01 : f32
    %350 = vector.broadcast %cst_171 : f32 to vector<16x1xf32>
    %351 = arith.divf %349, %350 : vector<16x1xf32>
    %352 = vector.broadcast %351 : vector<16x1xf32> to vector<16x32xf32>
    %353 = arith.subf %343, %352 : vector<16x32xf32>
    %354 = arith.mulf %353, %353 : vector<16x32xf32>
    %cst_172 = arith.constant dense<0.000000e+00> : vector<16xf32>
    %355 = vector.multi_reduction <add>, %354, %cst_172 [1] : vector<16x32xf32> to vector<16xf32>
    %356 = vector.shape_cast %355 : vector<16xf32> to vector<16x1xf32>
    %cst_173 = arith.constant 3.200000e+01 : f32
    %357 = vector.broadcast %cst_173 : f32 to vector<16x1xf32>
    %358 = arith.divf %356, %357 : vector<16x1xf32>
    %359 = vector.broadcast %351 : vector<16x1xf32> to vector<16x32xf32>
    %360 = arith.subf %343, %359 : vector<16x32xf32>
    %cst_174 = arith.constant 9.99999996E-13 : f32
    %361 = vector.broadcast %cst_174 : f32 to vector<16x1xf32>
    %362 = arith.addf %358, %361 : vector<16x1xf32>
    %363 = math.rsqrt %362 : vector<16x1xf32>
    %364 = vector.broadcast %363 : vector<16x1xf32> to vector<16x32xf32>
    %365 = arith.mulf %360, %364 : vector<16x32xf32>
    %366 = vector.broadcast %345 : vector<1x32xf32> to vector<16x32xf32>
    %367 = arith.mulf %365, %366 : vector<16x32xf32>
    %368 = vector.broadcast %347 : vector<1x32xf32> to vector<16x32xf32>
    %369 = arith.addf %367, %368 : vector<16x32xf32>
    %370 = vector.extract_strided_slice %369 {offsets = [0, 0], sizes = [1, 32], strides = [1, 1]} : vector<16x32xf32> to vector<1x32xf32>
    %371 = vector.extract_strided_slice %369 {offsets = [8, 0], sizes = [1, 32], strides = [1, 1]} : vector<16x32xf32> to vector<1x32xf32>
    %372 = tpu.concatenate %370, %371 in 0 : vector<1x32xf32>, vector<1x32xf32> -> vector<2x32xf32>
    %c0_175 = arith.constant 0 : index
    %c0_176 = arith.constant 0 : index
    %373 = vector.load %arg17[%c0_175, %c0_176] : memref<32x32xf32, #tpu.memory_space<vmem>>, vector<32x32xf32>
    %cst_177 = arith.constant dense<0.000000e+00> : vector<2x32xf32>
    %374 = tpu.matmul %372, %373, %cst_177 {dimension_numbers = #tpu.dot_dimension_numbers<[1], [0], [0], [1], [0, 0, 1, 1], [], []>} : vector<2x32xf32>, vector<32x32xf32>, vector<2x32xf32> -> vector<2x32xf32>
    %c0_178 = arith.constant 0 : index
    %c0_179 = arith.constant 0 : index
    %375 = vector.load %arg18[%c0_178, %c0_179] : memref<1x32xf32, #tpu.memory_space<vmem>>, vector<1x32xf32>
    %376 = vector.broadcast %375 : vector<1x32xf32> to vector<2x32xf32>
    %377 = arith.addf %374, %376 : vector<2x32xf32>
    %378 = math.tanh %377 : vector<2x32xf32>
    %c0_180 = arith.constant 0 : index
    %c0_181 = arith.constant 0 : index
    %379 = vector.load %arg19[%c0_180, %c0_181] : memref<32x1xf32, #tpu.memory_space<vmem>>, vector<32x1xf32>
    %cst_182 = arith.constant dense<0.000000e+00> : vector<2x1xf32>
    %380 = tpu.matmul %378, %379, %cst_182 {dimension_numbers = #tpu.dot_dimension_numbers<[1], [0], [0], [1], [0, 0, 1, 1], [], []>} : vector<2x32xf32>, vector<32x1xf32>, vector<2x1xf32> -> vector<2x1xf32>
    %c0_183 = arith.constant 0 : index
    %c0_184 = arith.constant 0 : index
    %381 = vector.load %arg20[%c0_183, %c0_184] : memref<1x1xf32, #tpu.memory_space<vmem>>, vector<1x1xf32>
    %382 = vector.broadcast %381 : vector<1x1xf32> to vector<2x1xf32>
    %383 = arith.addf %380, %382 : vector<2x1xf32>
    %c0_185 = arith.constant 0 : index
    %c0_186 = arith.constant 0 : index
    %384 = vector.load %arg22[%c0_185, %c0_186] : memref<2x1xf32, #tpu.memory_space<vmem>>, vector<2x1xf32>
    tpu.vector_store %arg22[%c0_185, %c0_186], %383 {strides = array<i32>} : memref<2x1xf32, #tpu.memory_space<vmem>>, vector<2x1xf32>,
    %c0_187 = arith.constant 0 : index
    %c0_188 = arith.constant 0 : index
    %385 = vector.load %arg2[%c0_187, %c0_188] : memref<2x1xf32, #tpu.memory_space<vmem>>, vector<2x1xf32>
    %386 = arith.subf %383, %385 : vector<2x1xf32>
    %387 = arith.mulf %386, %386 : vector<2x1xf32>
    %cst_189 = arith.constant dense<0.000000e+00> : vector<2xf32>
    %388 = vector.multi_reduction <add>, %387, %cst_189 [1] : vector<2x1xf32> to vector<2xf32>
    %389 = vector.shape_cast %388 : vector<2xf32> to vector<2x1xf32>
    %cst_190 = arith.constant dense<0.000000e+00> : vector<1xf32>
    %390 = vector.multi_reduction <add>, %389, %cst_190 [0] : vector<2x1xf32> to vector<1xf32>
    %391 = vector.shape_cast %390 : vector<1xf32> to vector<1x1xf32>
    %cst_191 = arith.constant 5.000000e-01 : f32
    %392 = vector.broadcast %cst_191 : f32 to vector<1x1xf32>
    %393 = arith.mulf %391, %392 : vector<1x1xf32>
    %c0_192 = arith.constant 0 : index
    %c0_193 = arith.constant 0 : index
    %394 = vector.load %arg21[%c0_192, %c0_193] : memref<1x1xf32, #tpu.memory_space<vmem>>, vector<1x1xf32>
    tpu.vector_store %arg21[%c0_192, %c0_193], %393 {strides = array<i32>} : memref<1x1xf32, #tpu.memory_space<vmem>>, vector<1x1xf32>,
    return
  }
}

</mosaic_0001>

<bundles_post_ra>
// kernel: mbert_forward.1
= control target key start
LH: loop header
LB: loop body
LE: loop exit
PB: predicated region body
PF: predicated region fallthrough
CT: control target
= control target key end

     0   :  { %s4544_s0 = inlined_call_operand.vmem [shape: f32[16,32], index: 0, kind: input, shape index: {}]   ;;  %s4545_s1 = inlined_call_operand.vmem [shape: f32[16,16], index: 1, kind: input, shape index: {}]   ;;  %s4546_s2 = inlined_call_operand.vmem [shape: f32[2,1], index: 2, kind: input, shape index: {}]   ;;  %s4547_s3 = inlined_call_operand.vmem [shape: f32[1,32], index: 3, kind: input, shape index: {}]   ;;  %s4548_s4 = inlined_call_operand.vmem [shape: f32[1,32], index: 4, kind: input, shape index: {}]   ;;  %s4549_s5 = inlined_call_operand.vmem [shape: f32[2,32,96], index: 5, kind: input, shape index: {}]   ;;  %s4550_s6 = inlined_call_operand.vmem [shape: f32[2,1,96], index: 6, kind: input, shape index: {}]   ;;  %s4551_s7 = inlined_call_operand.vmem [shape: f32[2,32,32], index: 7, kind: input, shape index: {}]   ;;  %s4552_s8 = inlined_call_operand.vmem [shape: f32[2,1,32], index: 8, kind: input, shape index: {}]   ;;  %s4553_s9 = inlined_call_operand.vmem [shape: f32[2,1,32], index: 9, kind: input, shape index: {}]   ;;  %s4554_s10 = inlined_call_operand.vmem [shape: f32[2,1,32], index: 10, kind: input, shape index: {}]   ;;  %s4555_s11 = inlined_call_operand.vmem [shape: f32[2,32,64], index: 11, kind: input, shape index: {}]   ;;  %s4556_s12 = inlined_call_operand.vmem [shape: f32[2,1,64], index: 12, kind: input, shape index: {}]   ;;  %s4557_s13 = inlined_call_operand.vmem [shape: f32[2,64,32], index: 13, kind: input, shape index: {}]   ;;  %s4558_s14 = inlined_call_operand.vmem [shape: f32[2,1,32], index: 14, kind: input, shape index: {}]   ;;  %s4559_s15 = inlined_call_operand.vmem [shape: f32[2,1,32], index: 15, kind: input, shape index: {}]   ;;  %s4560_s16 = inlined_call_operand.vmem [shape: f32[2,1,32], index: 16, kind: input, shape index: {}]   ;;  %s4561_s17 = inlined_call_operand.vmem [shape: f32[32,32], index: 17, kind: input, shape index: {}]   ;;  %s4562_s18 = inlined_call_operand.vmem [shape: f32[1,32], index: 18, kind: input, shape index: {}]   ;;  %s4563_s19 = inlined_call_operand.vmem [shape: f32[32,1], index: 19, kind: input, shape index: {}]   ;;  %s4564_s20 = inlined_call_operand.<no memory space> [shape: f32[1,1], index: 20, kind: input, shape index: {}]   ;;  %s4565_s21 = inlined_call_operand.hbm [shape: f32[1,1], index: 21, kind: output, shape index: {0}]   ;;  %s4566_s22 = inlined_call_operand.vmem [shape: f32[2,1], index: 22, kind: output, shape index: {1}]  }
   0x1   :  { %4587 = sst [smem:[#allocation7_spill]] %s4544_s0  ;;  %v28_v0 = vstv %s4564_s20 }
   0x2   :  { %4588 = sst [smem:[#allocation8_spill]] %s4545_s1  ;;  %29 = vst [vmem:[#allocation3] sm:$0x1] %v28_v0 }
   0x3   :  { %4589 = sst [smem:[#allocation9_spill]] %s4546_s2 }
   0x4   :  { %4590 = sst [smem:[#allocation10_spill]] %s4547_s3 }
   0x5   :  { %4591 = sst [smem:[#allocation11_spill]] %s4548_s4 }
   0x6   :  { %4592 = sst [smem:[#allocation12_spill]] %s4549_s5 }
   0x7   :  { %4593 = sst [smem:[#allocation13_spill]] %s4550_s6 }
   0x8   :  { %s4594_s4 = sld [smem:[#allocation7_spill]]  ;;  %vm79_vm0 = vcmask 261120  }
   0xe   :  { %v75_v1 = vld [vmem:[%s4594_s4] sm:$0xff]  ;;  %v76_v2 = vld [vmem:[%s4594_s4 + $0x8] sm:$0xff] }
   0xf   :  { %30 = vsyncpa [#allocation5], 0  ;;  %v80_v3 = vsel %vm79_vm0, %v75_v1, 0.0  ;;  %v83_v4 = vsel %vm79_vm0, %v76_v2, 0.0  ;;  %s4595_s5 = sld [smem:[#allocation12_spill]]  ;;  %s4596_s29 = sld [smem:[#allocation10_spill]] }
  0x10   :  { %81 = vadd.xlane.f32.xlu0 %v80_v3  ;;  %s4597_s0 = sld [smem:[#allocation11_spill]]  ;;  %s4598_s1 = sld [smem:[#allocation13_spill]]  ;;  %vm221_vm1 = vcmask 64512   ;;  %vm309_vm3 = vcmask 130048   ;;  %vm633_vm4 = vcmask 130112   ;;  %vm848_vm5 = vcmask 195712  }
  0x11   :  { %s3881_s24 = smov 88   ;;  %s3882_s6 = smov 96   ;;  %vm4076_vm2 = vmpackc.low %vm221_vm1, %vm221_vm1  ;;  %vm1063_vm6 = vcmask 261312   ;;  %vm1331_vm7 = vcmask 523264   ;;  %vm3896_vm8 = vmmov 0   ;;  %vm2804_vm9 = vcmask 1040384  }
  0x12   :  { %s3883_s25 = smov 120   ;;  %s4601_s27 = sld [smem:[#allocation8_spill]]  ;;  %vm2975_vm10 = vcmask 1024   ;;  %vm2989_vm11 = vcmask 0  }
  0x13   :  { %s4585_s30 = smov 64   ;;  %s4582_s4 = smov 80  }
  0x14   :  { %84 = vadd.xlane.f32.xlu0 %v83_v4  ;;  %s4579_s23 = smov 48   ;;  %s4577_s20 = smov 104  }
  0x15   :  { %v123_v15 = vld [vmem:[%s4595_s5] sm:$0xff]  ;;  %v124_v16 = vld [vmem:[%s4595_s5 + $0x8] sm:$0xff]  ;;  %v125_v17 = vld [vmem:[%s4595_s5 + $0x10] sm:$0xff]  ;;  %s4576_s26 = smov 72   ;;  %s4573_s2 = smov 40  }
  0x16   :  { %v3491_v18 = vpack.c.bf16 %v124_v16, %v123_v15  ;;  %v126_v19 = vld [vmem:[%s4595_s5 + $0x18] sm:$0xff]  ;;  %v3009_v28 = vld [vmem:[%s4596_s29] ss:$0 sm:$0xff]  ;;  %s4586_s29 = smov 56   ;;  %s4574_s3 = smov 8  }
  0x17   :  { %v3495_v20 = vpack.c.bf16 %v126_v19, %v125_v17  ;;  %v3010_v30 = vld [vmem:[%s4597_s0] ss:$0 sm:$0xff]  ;;  %s4580_s0 = smov 112   ;;  %s4571_s28 = smov 16  }
  0x18   :  { %3492 = vmatprep.subr.bf16.mxu0 %v3491_v18  ;;  %v3011_v37 = vld [vmem:[%s4598_s1] ss:$0 sm:$0xff]  ;;  %v4095_v55 = vld [vmem:[%s4601_s27 + $0x8] sm:$0xff] }
  0x19   :  { %3494 = vmatpush3.bf16.msra.mxu0 %v3491_v18  ;;  %v4100_v58 = vld [vmem:[%s4601_s27] sm:$0xff] }
  0x1a   :  { %3496 = vmatprep.subr.bf16.mxu0 %v3495_v20 }
  0x1d   :  { %3498 = vmatpush3.bf16.msra.mxu0 %v3495_v20 }
  0x9d   :  { %v82_v5 = vpop.xlane.xlu0 %81 }
  0x9e   :  { %v87_v6 = vmul.f32 0.03125, %v82_v5 }
  0xa0   :  { %v89_v7 = vsub.f32 %v75_v1, %v87_v6 }
  0xa1   :  { %v85_v8 = vpop.xlane.xlu0 %84 }
  0xa2   :  { %v88_v9 = vmul.f32 0.03125, %v85_v8  ;;  %v91_v10 = vmul.f32 %v89_v7, %v89_v7 }
  0xa4   :  { %v90_v11 = vsub.f32 %v76_v2, %v88_v9  ;;  %v93_v12 = vsel %vm79_vm0, %v91_v10, 0.0 }
  0xa5   :  { %94 = vadd.xlane.f32.xlu1 %v93_v12 }
  0xa6   :  { %v92_v13 = vmul.f32 %v90_v11, %v90_v11 }
  0xa8   :  { %v96_v14 = vsel %vm79_vm0, %v92_v13, 0.0 }
  0xa9   :  { %97 = vadd.xlane.f32.xlu1 %v96_v14 }
 0x132   :  { %v95_v21 = vpop.xlane.xlu1 %94 }
 0x133   :  { %v99_v22 = vmul.f32 0.03125, %v95_v21 }
 0x135   :  { %v101_v23 = vadd.f32 1e-12, %v99_v22 }
 0x136   :  { %v98_v24 = vpop.xlane.xlu1 %97 }
 0x137   :  { %3761 = vrsqrt.f32 %v101_v23  ;;  %v100_v25 = vmul.f32 0.03125, %v98_v24 }
 0x139   :  { %v102_v26 = vadd.f32 1e-12, %v100_v25 }
 0x13b   :  { %3763 = vrsqrt.f32 %v102_v26 }
 0x141   :  { %v3762_v27 = vpop.eup %3761 }
 0x142   :  { %v105_v29 = vmul.f32 %v3762_v27, %v89_v7 }
 0x144   :  { %v113_v31 = vmul.f32 %v3009_v28, %v105_v29 }
 0x145   :  { %v3764_v32 = vpop.eup %3763 }
 0x146   :  { %v106_v33 = vmul.f32 %v3764_v32, %v90_v11  ;;  %v4045_v34 = vadd.f32 %v3010_v30, %v113_v31 }
 0x148   :  { %v114_v35 = vmul.f32 %v3009_v28, %v106_v33  ;;  %3261 = vmatprep.mubr.msk.f32.mxu0 %vm79_vm0, %v4045_v34 }
 0x14a   :  { %v4049_v36 = vadd.f32 %v3010_v30, %v114_v35 }
 0x14c   :  { %3262 = vmatmul.mubr.msk.f32.vlgmr.msra.gmra.mrb[0].mxu0 %vm79_vm0, %v4049_v36 }
 0x21f   :  { %v3263_v38 = vpop.f32.mrb[0].mxu0 }
 0x220   :  { %v4056_v39 = vadd.f32 %v3263_v38, %v3011_v37  ;;  %v206_v40 = vpop.f32.mrb[1].mxu0 }
 0x221   :  { %v4058_v41 = vadd.f32 %v3011_v37, %v206_v40 }
 0x223   :  { %3268 = vmatprep.mubr.msk.f32.mxu1 %vm221_vm1, %v4058_v41  ;;  %v4064_v42 = vpack.i.bf16 %v4056_v39, %v4058_v41 }
 0x225   :  { %3687 = vrot.lane.b32.xlu1 %v4064_v42, %s3881_s24  ;;  %3682 = vrot.lane.b32.xlu0 %v4064_v42, %s3882_s6 }
 0x229   :  { %421 = vrot.lane.b32.xlu1 %v4058_v41, %s3883_s25 }
 0x22d   :  { %423 = vrot.lane.b32.xlu1 %v4056_v39, %s3883_s25 }
 0x297   :  { %v3688_v43 = vpop.permute.xlu1 %3687  ;;  %v3683_v44 = vpop.permute.xlu0 %3682 }
 0x298   :  { %v3690_v45 = vunpack.i.h.bf16 %v3688_v43  ;;  %v3689_v46 = vunpack.i.l.bf16 %v3688_v43  ;;  %v3685_v47 = vunpack.i.h.bf16 %v3683_v44  ;;  %v3684_v48 = vunpack.i.l.bf16 %v3683_v44 }
 0x29a   :  { %v3499_v50 = vpack.c.bf16 %v3685_v47, %v3684_v48  ;;  %v3509_v51 = vpack.c.bf16 %v3690_v45, %v3689_v46 }
 0x29b   :  { %v422_v52 = vpop.permute.xlu1 %421 }
 0x29c   :  { %3501 = vmatprep.subr.msk.bf16.mxu1 %vm4076_vm2, %v3499_v50 }
 0x29d   :  { %3504 = vmatpush3.bf16.xpose.msk.msra.mxu1 %vm4076_vm2, %v3499_v50 }
 0x29e   :  { %3511 = vmatprep.subr.msk.bf16.mxu1 %vm4076_vm2, %v3509_v51 }
 0x29f   :  { %v424_v53 = vpop.permute.xlu1 %423 }
 0x2a4   :  { %3269 = vmatmul.mubr.msk.f32.vlgmr.msra.gmra.mrb[0].mxu1 %vm221_vm1, %v4056_v39 }
 0x2a5   :  { %3514 = vmatpush3.bf16.xpose.msk.msra.mxu1 %vm4076_vm2, %v3509_v51  ;;  %3282 = vmatprep.mubr.msk.f32.mxu1 %vm221_vm1, %v422_v52 }
 0x2ac   :  { %3283 = vmatmul.mubr.msk.f32.vlgmr.msra.gmra.mrb[2].mxu1 %vm221_vm1, %v424_v53 }
 0x377   :  { %v3270_v54 = vpop.f32.mrb[0].mxu1 }
 0x378   :  { %v306_v56 = vmul.f32 0.35355338, %v3270_v54  ;;  %v296_v57 = vpop.f32.mrb[1].mxu1 }
 0x379   :  { %v305_v59 = vmul.f32 0.35355338, %v296_v57 }
 0x37a   :  { %v308_v60 = vadd.f32 %v306_v56, %v4095_v55 }
 0x37b   :  { %v307_v61 = vadd.f32 %v305_v59, %v4100_v58 }
 0x37c   :  { %v313_v62 = vsel %vm309_vm3, %v308_v60, -inf }
 0x37d   :  { %314 = vmax.xlane.f32.xlu1 %v313_v62  ;;  %v310_v63 = vsel %vm309_vm3, %v307_v61, -inf }
 0x37e   :  { %311 = vmax.xlane.f32.xlu0 %v310_v63 }
 0x37f   :  { %v3284_v0 = vpop.f32.mrb[2].mxu1 }
 0x380   :  { %v503_v1 = vpop.f32.mrb[3].mxu1  ;;  %v513_v2 = vmul.f32 0.35355338, %v3284_v0 }
 0x381   :  { %v512_v3 = vmul.f32 0.35355338, %v503_v1 }
 0x382   :  { %v515_v6 = vadd.f32 %v513_v2, %v4095_v55 }
 0x383   :  { %v514_v4 = vadd.f32 %v512_v3, %v4100_v58 }
 0x384   :  { %v519_v7 = vsel %vm309_vm3, %v515_v6, -inf }
 0x385   :  { %v516_v5 = vsel %vm309_vm3, %v514_v4, -inf }
 0x386   :  { %517 = vmax.xlane.f32.xlu0 %v516_v5 }
 0x38a   :  { %520 = vmax.xlane.f32.xlu0 %v519_v7 }
 0x40a   :  { %v315_v8 = vpop.xlane.xlu1 %314 }
 0x40b   :  { %v317_v9 = vsub.f32 %v308_v60, %v315_v8  ;;  %v312_v10 = vpop.xlane.xlu0 %311 }
 0x40c   :  { %v316_v11 = vsub.f32 %v307_v61, %v312_v10 }
 0x40d   :  { %v320_v12 = vmul.f32 1.442695, %v317_v9 }
 0x40e   :  { %v318_v13 = vmul.f32 1.442695, %v316_v11 }
 0x40f   :  { %3765 = vpow2.f32 %v320_v12 }
 0x410   :  { %3767 = vpow2.f32 %v318_v13 }
 0x413   :  { %v518_v14 = vpop.xlane.xlu0 %517 }
 0x414   :  { %v522_v15 = vsub.f32 %v514_v4, %v518_v14 }
 0x416   :  { %v524_v16 = vmul.f32 1.442695, %v522_v15 }
 0x417   :  { %v521_v17 = vpop.xlane.xlu0 %520 }
 0x418   :  { %3769 = vpow2.f32 %v524_v16  ;;  %v523_v18 = vsub.f32 %v515_v6, %v521_v17 }
 0x419   :  { %v3766_v19 = vpop.eup %3765 }
 0x41a   :  { %v3768_v20 = vpop.eup %3767  ;;  %v526_v21 = vmul.f32 1.442695, %v523_v18  ;;  %v325_v22 = vsel %vm309_vm3, %v3766_v19, 0.0 }
 0x41b   :  { %326 = vadd.xlane.f32.xlu1 %v325_v22  ;;  %v322_v23 = vsel %vm309_vm3, %v3768_v20, 0.0 }
 0x41c   :  { %3771 = vpow2.f32 %v526_v21  ;;  %323 = vadd.xlane.f32.xlu0 %v322_v23 }
 0x422   :  { %v3770_v24 = vpop.eup %3769 }
 0x423   :  { %v528_v25 = vsel %vm309_vm3, %v3770_v24, 0.0 }
 0x424   :  { %529 = vadd.xlane.f32.xlu0 %v528_v25 }
 0x426   :  { %v3772_v26 = vpop.eup %3771 }
 0x427   :  { %v531_v27 = vsel %vm309_vm3, %v3772_v26, 0.0 }
 0x428   :  { %532 = vadd.xlane.f32.xlu1 %v531_v27 }
 0x439   :  { %3697 = vrot.lane.b32.xlu1 %v4064_v42, %s4586_s29 }
 0x43a   :  { %3692 = vrot.lane.b32.xlu0 %v4064_v42, %s4585_s30  ;;  %s4606_s30 = smov 48  }
 0x43d   :  { %3702 = vrot.lane.b32.xlu1 %v4064_v42, %s4582_s4 }
 0x43e   :  { %638 = vrot.lane.b32.xlu0 %v4056_v39, %s4580_s0 }
 0x441   :  { %636 = vrot.lane.b32.xlu1 %v4058_v41, %s4580_s0 }
 0x4a8   :  { %v327_v29 = vpop.xlane.xlu1 %326 }
 0x4a9   :  { %v324_v28 = vpop.xlane.xlu0 %323 }
 0x4aa   :  { %3773 = vrcp.f32 %v324_v28 }
 0x4ab   :  { %3775 = vrcp.f32 %v327_v29 }
 0x4b1   :  { %v530_v30 = vpop.xlane.xlu0 %529 }
 0x4b2   :  { %3777 = vrcp.f32 %v530_v30 }
 0x4b4   :  { %v3774_v31 = vpop.eup %3773 }
 0x4b5   :  { %v533_v32 = vpop.xlane.xlu1 %532  ;;  %v3693_v33 = vpop.permute.xlu0 %3692  ;;  %v330_v35 = vmul.f32 %v3774_v31, %v3768_v20 }
 0x4b6   :  { %3779 = vrcp.f32 %v533_v32  ;;  %v3695_v37 = vunpack.i.h.bf16 %v3693_v33  ;;  %v3694_v38 = vunpack.i.l.bf16 %v3693_v33  ;;  %v3776_v43 = vpop.eup %3775 }
 0x4b7   :  { %3275 = vmatprep.mubr.msk.f32.mxu0 %vm309_vm3, %v330_v35  ;;  %v331_v48 = vmul.f32 %v3776_v43, %v3766_v19 }
 0x4b8   :  { %v3505_v40 = vpack.c.bf16 %v3695_v37, %v3694_v38 }
 0x4b9   :  { %v3698_v44 = vpop.permute.xlu1 %3697  ;;  %v639_v61 = vpop.permute.xlu0 %638 }
 0x4ba   :  { %v3700_v45 = vunpack.i.h.bf16 %v3698_v44  ;;  %v3699_v46 = vunpack.i.l.bf16 %v3698_v44  ;;  %3506 = vmatprep.subr.bf16.mxu0 %v3505_v40 }
 0x4bb   :  { %3508 = vmatpush3.bf16.msra.mxu0 %v3505_v40 }
 0x4bc   :  { %v3778_v47 = vpop.eup %3777  ;;  %v3515_v50 = vpack.c.bf16 %v3700_v45, %v3699_v46 }
 0x4bd   :  { %v3703_v51 = vpop.permute.xlu1 %3702  ;;  %v536_v52 = vmul.f32 %v3778_v47, %v3770_v24 }
 0x4be   :  { %v3705_v53 = vunpack.i.h.bf16 %v3703_v51  ;;  %v3704_v54 = vunpack.i.l.bf16 %v3703_v51  ;;  %3276 = vmatmul.mubr.msk.f32.vlgmr.msra.gmra.mrb[2].mxu0 %vm309_vm3, %v331_v48  ;;  %3516 = vmatprep.subr.bf16.mxu0 %v3515_v50 }
 0x4bf   :  { %3518 = vmatpush3.bf16.msra.mxu0 %v3515_v50  ;;  %3289 = vmatprep.mubr.msk.f32.mxu0 %vm309_vm3, %v536_v52 }
 0x4c0   :  { %v3780_v56 = vpop.eup %3779  ;;  %v3519_v57 = vpack.c.bf16 %v3705_v53, %v3704_v54 }
 0x4c1   :  { %v537_v59 = vmul.f32 %v3780_v56, %v3772_v26  ;;  %v637_v60 = vpop.permute.xlu1 %636 }
 0x4c2   :  { %3521 = vmatprep.subr.msk.bf16.mxu0 %vm4076_vm2, %v3519_v57 }
 0x4c3   :  { %3290 = vmatmul.mubr.msk.f32.vlgmr.msra.gmra.mrb[4].mxu0 %vm309_vm3, %v537_v59 }
 0x4c4   :  { %3296 = vmatprep.mubr.msk.f32.mxu0 %vm221_vm1, %v637_v60 }
 0x4c8   :  { %3524 = vmatpush3.bf16.xpose.msk.msra.mxu0 %vm4076_vm2, %v3519_v57 }
 0x4cf   :  { %3297 = vmatmul.mubr.msk.f32.vlgmr.msra.gmra.mrb[6].mxu0 %vm221_vm1, %v639_v61 }
 0x591   :  { %v3277_v62 = vpop.f32.mrb[2].mxu0 }
 0x592   :  { %420 = vst.msk [vmem:[#allocation2 + $0x8] sm:$0xff] %vm221_vm1, %v3277_v62  ;;  %v410_v63 = vpop.f32.mrb[3].mxu0 }
 0x593   :  { %419 = vst.msk [vmem:[#allocation2] sm:$0xff] %vm221_vm1, %v410_v63 }
 0x596   :  { %v4136_v0 = vpop.f32.mrb[4].mxu0 }
 0x597   :  { %v4138_v1 = vpop.f32.mrb[5].mxu0 }
 0x5a2   :  { %v3298_v2 = vpop.f32.mrb[6].mxu0 }
 0x5a3   :  { %v728_v3 = vmul.f32 0.35355338, %v3298_v2  ;;  %v718_v4 = vpop.f32.mrb[7].mxu0 }
 0x5a4   :  { %v727_v5 = vmul.f32 0.35355338, %v718_v4 }
 0x5a5   :  { %v730_v6 = vadd.f32 %v728_v3, %v4095_v55 }
 0x5a6   :  { %v729_v7 = vadd.f32 %v727_v5, %v4100_v58 }
 0x5a7   :  { %v734_v8 = vsel %vm309_vm3, %v730_v6, -inf }
 0x5a8   :  { %735 = vmax.xlane.f32.xlu0 %v734_v8  ;;  %v731_v9 = vsel %vm309_vm3, %v729_v7, -inf }
 0x5a9   :  { %732 = vmax.xlane.f32.xlu1 %v731_v9 }
 0x5ba   :  { %3707 = vrot.lane.b32.xlu1 %v4064_v42, %s4579_s23 }
 0x5be   :  { %851 = vrot.lane.b32.xlu1 %v4058_v41, %s4577_s20 }
 0x5c2   :  { %853 = vrot.lane.b32.xlu1 %v4056_v39, %s4577_s20  ;;  %s4612_s20 = smov 24  }
 0x635   :  { %v736_v10 = vpop.xlane.xlu0 %735 }
 0x636   :  { %v738_v11 = vsub.f32 %v730_v6, %v736_v10  ;;  %v733_v12 = vpop.xlane.xlu1 %732 }
 0x637   :  { %v737_v13 = vsub.f32 %v729_v7, %v733_v12  ;;  %v1069_v12 = vld [vmem:[%s4551_s7 + $0x8] sm:$0xff] }
 0x638   :  { %v741_v14 = vmul.f32 1.442695, %v738_v11 }
 0x639   :  { %v739_v15 = vmul.f32 1.442695, %v737_v13 }
 0x63a   :  { %3781 = vpow2.f32 %v741_v14  ;;  %v3708_v16 = vpop.permute.xlu1 %3707  ;;  %v1070_v14 = vld [vmem:[%s4551_s7 + $0x10] sm:$0xff] }
 0x63b   :  { %v3710_v17 = vunpack.i.h.bf16 %v3708_v16  ;;  %v3709_v18 = vunpack.i.l.bf16 %v3708_v16  ;;  %3783 = vpow2.f32 %v739_v15  ;;  %v1071_v15 = vld [vmem:[%s4551_s7 + $0x18] sm:$0xff] }
 0x63c   :  { %v3543_v16 = vpack.c.bf16 %v1071_v15, %v1070_v14  ;;  %v3043_v15 = vld [vmem:[%s4556_s12] ss:$0 sm:$0xff] }
 0x63d   :  { %v3525_v19 = vpack.c.bf16 %v3710_v17, %v3709_v18 }
 0x63e   :  { %v852_v32 = vpop.permute.xlu1 %851 }
 0x63f   :  { %3526 = vmatprep.subr.bf16.mxu1 %v3525_v19 }
 0x640   :  { %3528 = vmatpush3.bf16.msra.mxu1 %v3525_v19 }
 0x642   :  { %v854_v33 = vpop.permute.xlu1 %853 }
 0x644   :  { %v3782_v20 = vpop.eup %3781 }
 0x645   :  { %v746_v41 = vsel %vm309_vm3, %v3782_v20, 0.0  ;;  %v3784_v21 = vpop.eup %3783 }
 0x646   :  { %747 = vadd.xlane.f32.xlu0 %v746_v41  ;;  %v743_v39 = vsel %vm309_vm3, %v3784_v21, 0.0 }
 0x64a   :  { %744 = vadd.xlane.f32.xlu0 %v743_v39  ;;  %v3038_v39 = vld [vmem:[%s4552_s8] ss:$0 sm:$0xff] }
 0x660   :  { %3712 = vrot.lane.b32.xlu0 %v4064_v42, %s4576_s26  ;;  %s4607_s26 = smov 104  }
 0x6d3   :  { %v748_v22 = vpop.xlane.xlu0 %747 }
 0x6d4   :  { %3785 = vrcp.f32 %v748_v22 }
 0x6d7   :  { %v745_v23 = vpop.xlane.xlu0 %744 }
 0x6d8   :  { %3787 = vrcp.f32 %v745_v23 }
 0x6db   :  { %v3713_v24 = vpop.permute.xlu0 %3712 }
 0x6dc   :  { %v3715_v25 = vunpack.i.h.bf16 %v3713_v24  ;;  %v3714_v26 = vunpack.i.l.bf16 %v3713_v24 }
 0x6de   :  { %v3529_v27 = vpack.c.bf16 %v3715_v25, %v3714_v26  ;;  %v3786_v28 = vpop.eup %3785 }
 0x6df   :  { %v752_v31 = vmul.f32 %v3786_v28, %v3782_v20 }
 0x6e0   :  { %3531 = vmatprep.subr.msk.bf16.mxu1 %vm4076_vm2, %v3529_v27 }
 0x6e2   :  { %v3788_v29 = vpop.eup %3787 }
 0x6e3   :  { %v751_v30 = vmul.f32 %v3788_v29, %v3784_v21 }
 0x6e5   :  { %3303 = vmatprep.mubr.msk.f32.mxu1 %vm309_vm3, %v751_v30 }
 0x6e6   :  { %3304 = vmatmul.mubr.msk.f32.vlgmr.msra.gmra.mrb[4].mxu1 %vm309_vm3, %v752_v31 }
 0x6e7   :  { %3534 = vmatpush3.bf16.xpose.msk.msra.mxu1 %vm4076_vm2, %v3529_v27  ;;  %3310 = vmatprep.mubr.msk.f32.mxu1 %vm221_vm1, %v852_v32 }
 0x6ee   :  { %3311 = vmatmul.mubr.msk.f32.vlgmr.msra.gmra.mrb[6].mxu1 %vm221_vm1, %v854_v33 }
 0x7b9   :  { %v3305_v35 = vpop.f32.mrb[4].mxu1 }
 0x7ba   :  { %v831_v37 = vpop.f32.mrb[5].mxu1 }
 0x7c1   :  { %v3312_v38 = vpop.f32.mrb[6].mxu1 }
 0x7c2   :  { %v943_v40 = vmul.f32 0.35355338, %v3312_v38  ;;  %v933_v43 = vpop.f32.mrb[7].mxu1 }
 0x7c3   :  { %v942_v44 = vmul.f32 0.35355338, %v933_v43 }
 0x7c4   :  { %v945_v45 = vadd.f32 %v943_v40, %v4095_v55 }
 0x7c5   :  { %v944_v46 = vadd.f32 %v942_v44, %v4100_v58  ;;  %v1207_v44 = vld [vmem:[%s4555_s11 + $0x8] sm:$0xff] }
 0x7c6   :  { %v949_v47 = vsel %vm309_vm3, %v945_v45, -inf }
 0x7c7   :  { %950 = vmax.xlane.f32.xlu0 %v949_v47  ;;  %v946_v48 = vsel %vm309_vm3, %v944_v46, -inf  ;;  %v1209_v47 = vld [vmem:[%s4555_s11 + $0x18] sm:$0xff] }
 0x7c8   :  { %947 = vmax.xlane.f32.xlu1 %v946_v48 }
 0x7d9   :  { %3717 = vrot.lane.b32.xlu1 %v4064_v42, %s4573_s2  ;;  %s4583_s2 = smov 24  }
 0x7dd   :  { %629 = vrot.lane.b32.xlu1 %v4136_v0, %s4574_s3 }
 0x7e1   :  { %842 = vrot.lane.b32.xlu1 %v831_v37, %s4571_s28 }
 0x7e5   :  { %844 = vrot.lane.b32.xlu1 %v3305_v35, %s4571_s28  ;;  %s4613_s28 = sld [smem:[#allocation9_spill]] }
 0x854   :  { %v951_v50 = vpop.xlane.xlu0 %950 }
 0x855   :  { %v953_v51 = vsub.f32 %v945_v45, %v951_v50  ;;  %v948_v52 = vpop.xlane.xlu1 %947 }
 0x856   :  { %v952_v53 = vsub.f32 %v944_v46, %v948_v52  ;;  %v1208_v46 = vld [vmem:[%s4555_s11 + $0x10] sm:$0xff] }
 0x857   :  { %v956_v54 = vmul.f32 1.442695, %v953_v51  ;;  %v3551_v48 = vpack.c.bf16 %v1209_v47, %v1208_v46 }
 0x858   :  { %v954_v56 = vmul.f32 1.442695, %v952_v53 }
 0x859   :  { %v3718_v57 = vpop.permute.xlu1 %3717 }
 0x85a   :  { %3789 = vpow2.f32 %v954_v56  ;;  %v3720_v59 = vunpack.i.h.bf16 %v3718_v57  ;;  %v3719_v60 = vunpack.i.l.bf16 %v3718_v57 }
 0x85b   :  { %3791 = vpow2.f32 %v956_v54 }
 0x85c   :  { %v3535_v42 = vpack.c.bf16 %v3720_v59, %v3719_v60  ;;  %v3041_v59 = vld [vmem:[%s4553_s9] ss:$0 sm:$0xff] }
 0x85d   :  { %v630_v61 = vpop.permute.xlu1 %629 }
 0x85e   :  { %635 = vst.msk [vmem:[#allocation2 + $0x8] sm:$0xff] %vm633_vm4, %v630_v61  ;;  %3536 = vmatprep.subr.bf16.mxu0 %v3535_v42 }
 0x85f   :  { %3538 = vmatpush3.bf16.msra.mxu0 %v3535_v42  ;;  %v3042_v42 = vld [vmem:[%s4554_s10] ss:$0 sm:$0xff] }
 0x861   :  { %v843_v62 = vpop.permute.xlu1 %842 }
 0x864   :  { %v3790_v63 = vpop.eup %3789 }
 0x865   :  { %v845_v0 = vpop.permute.xlu1 %844  ;;  %v958_v2 = vsel %vm309_vm3, %v3790_v63, 0.0  ;;  %v3792_v3 = vpop.eup %3791 }
 0x866   :  { %850 = vst.msk [vmem:[#allocation2 + $0x8] sm:$0xff] %vm848_vm5, %v845_v0  ;;  %959 = vadd.xlane.f32.xlu0 %v958_v2  ;;  %v961_v4 = vsel %vm309_vm3, %v3792_v3, 0.0 }
 0x86a   :  { %962 = vadd.xlane.f32.xlu0 %v961_v4  ;;  %v1316_v4 = vld [vmem:[%s4557_s13] sm:$0xff] }
 0x880   :  { %627 = vrot.lane.b32.xlu0 %v4138_v1, %s4574_s3  ;;  %v1068_v1 = vld [vmem:[%s4551_s7] sm:$0xff]  ;;  %s4611_s3 = smov 16  }
 0x881   :  { %v3539_v13 = vpack.c.bf16 %v1069_v12, %v1068_v1  ;;  %v1322_v12 = vld [vmem:[%s4557_s13 + $0x30] sm:$0xff] }
 0x883   :  { %3540 = vmatprep.subr.bf16.mxu0 %v3539_v13 }
 0x8f3   :  { %v960_v5 = vpop.xlane.xlu0 %959 }
 0x8f4   :  { %3793 = vrcp.f32 %v960_v5  ;;  %v1317_v5 = vld [vmem:[%s4557_s13 + $0x8] sm:$0xff] }
 0x8f7   :  { %v963_v6 = vpop.xlane.xlu0 %962 }
 0x8f8   :  { %3795 = vrcp.f32 %v963_v6  ;;  %v3555_v6 = vpack.c.bf16 %v1317_v5, %v1316_v4 }
 0x8fb   :  { %v628_v7 = vpop.permute.xlu0 %627 }
 0x8fc   :  { %634 = vst.msk [vmem:[#allocation2] sm:$0xff] %vm633_vm4, %v628_v7  ;;  %v1318_v7 = vld [vmem:[%s4557_s13 + $0x10] sm:$0xff] }
 0x8fd   :  { %849 = vst.msk [vmem:[#allocation2] sm:$0xff] %vm848_vm5, %v843_v62 }
 0x8fe   :  { %v3794_v8 = vpop.eup %3793 }
 0x8ff   :  { %v966_v9 = vmul.f32 %v3794_v8, %v3790_v63  ;;  %v1319_v8 = vld [vmem:[%s4557_s13 + $0x18] sm:$0xff] }
 0x901   :  { %3317 = vmatprep.mubr.msk.f32.mxu0 %vm309_vm3, %v966_v9  ;;  %v1320_v9 = vld [vmem:[%s4557_s13 + $0x20] sm:$0xff] }
 0x902   :  { %v3796_v10 = vpop.eup %3795 }
 0x903   :  { %v967_v11 = vmul.f32 %v3796_v10, %v3792_v3  ;;  %v3559_v10 = vpack.c.bf16 %v1319_v8, %v1318_v7 }
 0x905   :  { %3318 = vmatmul.mubr.msk.f32.vlgmr.msra.gmra.mrb[8].mxu0 %vm309_vm3, %v967_v11  ;;  %v1321_v11 = vld [vmem:[%s4557_s13 + $0x28] sm:$0xff] }
 0x906   :  { %3542 = vmatpush3.bf16.msra.mxu0 %v3539_v13  ;;  %v3563_v1 = vpack.c.bf16 %v1321_v11, %v1320_v9  ;;  %v1323_v13 = vld [vmem:[%s4557_s13 + $0x38] sm:$0xff] }
 0x907   :  { %3544 = vmatprep.subr.bf16.mxu0 %v3543_v16  ;;  %v3567_v14 = vpack.c.bf16 %v1323_v13, %v1322_v12  ;;  %v3050_v13 = vld [vmem:[%s4560_s16] ss:$0 sm:$0xff] }
 0x90a   :  { %3546 = vmatpush3.bf16.msra.mxu0 %v3543_v16 }
 0x90b   :  { %3556 = vmatprep.subr.bf16.mxu0 %v3555_v6 }
 0x9d8   :  { %v3319_v17 = vpop.f32.mrb[8].mxu0 }
 0x9d9   :  { %1059 = vrot.lane.b32.xlu1 %v3319_v17, %s4583_s2  ;;  %v1046_v18 = vpop.f32.mrb[9].mxu0 }
 0x9da   :  { %1057 = vrot.lane.b32.xlu0 %v1046_v18, %s4583_s2  ;;  %s4609_s2 = smov 40  }
 0xa4b   :  { %v1060_v19 = vpop.permute.xlu1 %1059 }
 0xa4c   :  { %1065 = vst.msk [vmem:[#allocation2 + $0x8] sm:$0xff] %vm1063_vm6, %v1060_v19  ;;  %v1058_v20 = vpop.permute.xlu0 %1057 }
 0xa4d   :  { %1064 = vst.msk [vmem:[#allocation2] sm:$0xff] %vm1063_vm6, %v1058_v20 }
 0xa53   :  { %v1067_v21 = vld [vmem:[#allocation2 + $0x8] sm:$0xff] }
 0xa54   :  { %v1066_v41 = vld [vmem:[#allocation2] sm:$0xff] }
 0xa55   :  { %3328 = vmatprep.mubr.msk.f32.mxu0 %vm79_vm0, %v1066_v41 }
 0xa56   :  { %3329 = vmatmul.mubr.msk.f32.vlgmr.msra.gmra.mrb[10].mxu0 %vm79_vm0, %v1067_v21 }
 0xa57   :  { %3558 = vmatpush3.bf16.msra.mxu0 %v3555_v6 }
 0xa58   :  { %3560 = vmatprep.subr.bf16.mxu0 %v3559_v10 }
 0xa5b   :  { %3562 = vmatpush3.bf16.msra.mxu0 %v3559_v10  ;;  %v3049_v10 = vld [vmem:[%s4559_s15] ss:$0 sm:$0xff] }
 0xa5c   :  { %3564 = vmatprep.subr.bf16.mxu0 %v3563_v1 }
 0xa5f   :  { %3566 = vmatpush3.bf16.msra.mxu0 %v3563_v1 }
 0xa60   :  { %3568 = vmatprep.subr.bf16.mxu0 %v3567_v14 }
 0xa63   :  { %3570 = vmatpush3.bf16.msra.mxu0 %v3567_v14 }
 0xb29   :  { %v3330_v22 = vpop.f32.mrb[10].mxu0 }
 0xb2a   :  { %v1157_v23 = vadd.f32 %v3330_v22, %v3038_v39  ;;  %v1151_v24 = vpop.f32.mrb[11].mxu0 }
 0xb2b   :  { %v1152_v25 = vadd.f32 %v3038_v39, %v1151_v24 }
 0xb2c   :  { %v1161_v26 = vadd.f32 %v1157_v23, %v4049_v36 }
 0xb2d   :  { %v1160_v27 = vadd.f32 %v1152_v25, %v4045_v34  ;;  %v1206_v34 = vld [vmem:[%s4555_s11] sm:$0xff] }
 0xb2e   :  { %v1167_v28 = vsel %vm79_vm0, %v1161_v26, 0.0  ;;  %v3547_v45 = vpack.c.bf16 %v1207_v44, %v1206_v34 }
 0xb2f   :  { %1168 = vadd.xlane.f32.xlu1 %v1167_v28  ;;  %v1164_v29 = vsel %vm79_vm0, %v1160_v27, 0.0 }
 0xb30   :  { %1165 = vadd.xlane.f32.xlu0 %v1164_v29  ;;  %3548 = vmatprep.subr.bf16.mxu1 %v3547_v45 }
 0xb31   :  { %3550 = vmatpush3.bf16.msra.mxu1 %v3547_v45 }
 0xb32   :  { %3552 = vmatprep.subr.bf16.mxu1 %v3551_v48 }
 0xb35   :  { %3554 = vmatpush3.bf16.msra.mxu1 %v3551_v48 }
 0xbbc   :  { %v1169_v30 = vpop.xlane.xlu1 %1168 }
 0xbbd   :  { %v1171_v31 = vmul.f32 0.03125, %v1169_v30  ;;  %v1166_v32 = vpop.xlane.xlu0 %1165 }
 0xbbe   :  { %v1170_v33 = vmul.f32 0.03125, %v1166_v32 }
 0xbbf   :  { %v1173_v35 = vsub.f32 %v1161_v26, %v1171_v31 }
 0xbc0   :  { %v1172_v37 = vsub.f32 %v1160_v27, %v1170_v33 }
 0xbc1   :  { %v1175_v43 = vmul.f32 %v1173_v35, %v1173_v35 }
 0xbc2   :  { %v1174_v38 = vmul.f32 %v1172_v37, %v1172_v37 }
 0xbc3   :  { %v1179_v36 = vsel %vm79_vm0, %v1175_v43, 0.0 }
 0xbc4   :  { %v1176_v40 = vsel %vm79_vm0, %v1174_v38, 0.0  ;;  %v3046_v38 = vld [vmem:[%s4558_s14] ss:$0 sm:$0xff] }
 0xbc5   :  { %1177 = vadd.xlane.f32.xlu0 %v1176_v40 }
 0xbc9   :  { %1180 = vadd.xlane.f32.xlu0 %v1179_v36 }
 0xc52   :  { %v1178_v50 = vpop.xlane.xlu0 %1177 }
 0xc53   :  { %v1182_v51 = vmul.f32 0.03125, %v1178_v50 }
 0xc55   :  { %v1184_v52 = vadd.f32 1e-12, %v1182_v51 }
 0xc56   :  { %v1181_v53 = vpop.xlane.xlu0 %1180 }
 0xc57   :  { %3797 = vrsqrt.f32 %v1184_v52  ;;  %v1183_v54 = vmul.f32 0.03125, %v1181_v53 }
 0xc59   :  { %v1185_v56 = vadd.f32 1e-12, %v1183_v54 }
 0xc5b   :  { %3799 = vrsqrt.f32 %v1185_v56 }
 0xc61   :  { %v3798_v57 = vpop.eup %3797 }
 0xc62   :  { %v1188_v60 = vmul.f32 %v3798_v57, %v1172_v37 }
 0xc64   :  { %v1196_v61 = vmul.f32 %v3041_v59, %v1188_v60 }
 0xc65   :  { %v3800_v62 = vpop.eup %3799 }
 0xc66   :  { %v1189_v63 = vmul.f32 %v3800_v62, %v1173_v35  ;;  %v1204_v0 = vadd.f32 %v3042_v42, %v1196_v61  ;;  %v3052_v61 = vld [vmem:[%s4595_s5 + $0x28] sm:$0xff] }
 0xc68   :  { %v1197_v2 = vmul.f32 %v3041_v59, %v1189_v63  ;;  %3339 = vmatprep.mubr.msk.f32.mxu1 %vm79_vm0, %v1204_v0  ;;  %v3053_v63 = vld [vmem:[%s4595_s5 + $0x30] sm:$0xff] }
 0xc6a   :  { %v1205_v3 = vadd.f32 %v3042_v42, %v1197_v2  ;;  %v3051_v42 = vld [vmem:[%s4595_s5 + $0x20] sm:$0xff] }
 0xc6b   :  { %v3571_v62 = vpack.c.bf16 %v3052_v61, %v3051_v42 }
 0xc6c   :  { %3340 = vmatmul.mubr.msk.f32.vlgmr.msra.gmra.mrb[8].mxu1 %vm79_vm0, %v1205_v3 }
 0xc6d   :  { %3572 = vmatprep.subr.bf16.mxu1 %v3571_v62 }
 0xc6e   :  { %3574 = vmatpush3.bf16.msra.mxu1 %v3571_v62 }
 0xd3f   :  { %v3341_v16 = vpop.f32.mrb[8].mxu1 }
 0xd40   :  { %v1295_v17 = vadd.f32 %v3341_v16, %v3043_v15  ;;  %v1289_v18 = vpop.f32.mrb[9].mxu1 }
 0xd41   :  { %v1290_v19 = vadd.f32 %v3043_v15, %v1289_v18  ;;  %v3056_v18 = vld [vmem:[%s4598_s1 + $0x1] ss:$0 sm:$0xff]  ;;  %s4602_s1 = smov 56  }
 0xd42   :  { %v1301_v20 = vmul.f32 0.044715, %v1295_v17  ;;  %v1299_v33 = vmul.f32 0.5, %v1295_v17 }
 0xd43   :  { %v1300_v41 = vmul.f32 0.044715, %v1290_v19  ;;  %v1298_v31 = vmul.f32 0.5, %v1290_v19 }
 0xd44   :  { %v1303_v21 = vmul.f32 %v1301_v20, %v1295_v17 }
 0xd45   :  { %v1302_v39 = vmul.f32 %v1300_v41, %v1290_v19 }
 0xd46   :  { %v1305_v22 = vmul.f32 %v1303_v21, %v1295_v17 }
 0xd47   :  { %v1304_v23 = vmul.f32 %v1302_v39, %v1290_v19 }
 0xd48   :  { %v1307_v24 = vadd.f32 %v1305_v22, %v1295_v17 }
 0xd49   :  { %v1306_v25 = vadd.f32 %v1304_v23, %v1290_v19 }
 0xd4a   :  { %v1309_v26 = vmul.f32 0.7978846, %v1307_v24 }
 0xd4b   :  { %v1308_v27 = vmul.f32 0.7978846, %v1306_v25 }
 0xd4c   :  { %3801 = vtanh.f32 %v1309_v26 }
 0xd4d   :  { %3803 = vtanh.f32 %v1308_v27 }
 0xd56   :  { %v3802_v28 = vpop.eup %3801 }
 0xd57   :  { %v3804_v29 = vpop.eup %3803  ;;  %v1313_v30 = vadd.f32 1.0, %v3802_v28 }
 0xd58   :  { %v1312_v32 = vadd.f32 1.0, %v3804_v29 }
 0xd59   :  { %v1315_v37 = vmul.f32 %v1313_v30, %v1299_v33 }
 0xd5a   :  { %v1314_v35 = vmul.f32 %v1312_v32, %v1298_v31 }
 0xd5c   :  { %3358 = vmatprep.mubr.msk.f32.mxu0 %vm1331_vm7, %v1314_v35 }
 0xd5d   :  { %3359 = vmatmul.mubr.msk.f32.vlgmr.msra.gmra.mrb[12].mxu0 %vm1331_vm7, %v1315_v37 }
 0xe30   :  { %v3360_v40 = vpop.f32.mrb[12].mxu0 }
 0xe31   :  { %v1410_v43 = vadd.f32 %v3360_v40, %v3046_v38  ;;  %v1404_v36 = vpop.f32.mrb[13].mxu0 }
 0xe32   :  { %v1405_v34 = vadd.f32 %v3046_v38, %v1404_v36 }
 0xe33   :  { %v1414_v44 = vadd.f32 %v1410_v43, %v1205_v3 }
 0xe34   :  { %v1413_v45 = vadd.f32 %v1405_v34, %v1204_v0  ;;  %v3054_v0 = vld [vmem:[%s4595_s5 + $0x38] sm:$0xff]  ;;  %s4610_s5 = smov 8  }
 0xe35   :  { %v1420_v46 = vsel %vm79_vm0, %v1414_v44, 0.0  ;;  %v3575_v2 = vpack.c.bf16 %v3054_v0, %v3053_v63 }
 0xe36   :  { %1421 = vadd.xlane.f32.xlu1 %v1420_v46  ;;  %v1417_v47 = vsel %vm79_vm0, %v1413_v45, 0.0 }
 0xe37   :  { %1418 = vadd.xlane.f32.xlu0 %v1417_v47  ;;  %3576 = vmatprep.subr.bf16.mxu1 %v3575_v2 }
 0xe38   :  { %3578 = vmatpush3.bf16.msra.mxu1 %v3575_v2 }
 0xec3   :  { %v1422_v48 = vpop.xlane.xlu1 %1421 }
 0xec4   :  { %v1424_v50 = vmul.f32 0.03125, %v1422_v48  ;;  %v1419_v51 = vpop.xlane.xlu0 %1418 }
 0xec5   :  { %v1423_v52 = vmul.f32 0.03125, %v1419_v51 }
 0xec6   :  { %v1426_v53 = vsub.f32 %v1414_v44, %v1424_v50 }
 0xec7   :  { %v1425_v54 = vsub.f32 %v1413_v45, %v1423_v52 }
 0xec8   :  { %v1428_v56 = vmul.f32 %v1426_v53, %v1426_v53 }
 0xec9   :  { %v1427_v57 = vmul.f32 %v1425_v54, %v1425_v54 }
 0xeca   :  { %v1432_v59 = vsel %vm79_vm0, %v1428_v56, 0.0 }
 0xecb   :  { %1433 = vadd.xlane.f32.xlu1 %v1432_v59  ;;  %v1429_v60 = vsel %vm79_vm0, %v1427_v57, 0.0 }
 0xecc   :  { %1430 = vadd.xlane.f32.xlu0 %v1429_v60 }
 0xf58   :  { %v1434_v3 = vpop.xlane.xlu1 %1433 }
 0xf59   :  { %v1436_v4 = vmul.f32 0.03125, %v1434_v3  ;;  %v1431_v5 = vpop.xlane.xlu0 %1430 }
 0xf5a   :  { %v1435_v6 = vmul.f32 0.03125, %v1431_v5 }
 0xf5b   :  { %v1438_v7 = vadd.f32 1e-12, %v1436_v4 }
 0xf5c   :  { %v1437_v8 = vadd.f32 1e-12, %v1435_v6 }
 0xf5d   :  { %3805 = vrsqrt.f32 %v1438_v7 }
 0xf5e   :  { %3807 = vrsqrt.f32 %v1437_v8 }
 0xf67   :  { %v3806_v9 = vpop.eup %3805 }
 0xf68   :  { %v3808_v11 = vpop.eup %3807  ;;  %v1442_v1 = vmul.f32 %v3806_v9, %v1426_v53 }
 0xf69   :  { %v1441_v12 = vmul.f32 %v3808_v11, %v1425_v54 }
 0xf6a   :  { %v1450_v14 = vmul.f32 %v3049_v10, %v1442_v1 }
 0xf6b   :  { %v1449_v15 = vmul.f32 %v3049_v10, %v1441_v12 }
 0xf6c   :  { %v4285_v17 = vadd.f32 %v3050_v13, %v1450_v14 }
 0xf6d   :  { %v4283_v16 = vadd.f32 %v3050_v13, %v1449_v15 }
 0xf6f   :  { %3369 = vmatprep.mubr.msk.f32.mxu1 %vm79_vm0, %v4283_v16 }
 0xf70   :  { %3370 = vmatmul.mubr.msk.f32.vlgmr.msra.gmra.mrb[10].mxu1 %vm79_vm0, %v4285_v17 }
0x1043   :  { %v3371_v19 = vpop.f32.mrb[10].mxu1 }
0x1044   :  { %v4294_v20 = vadd.f32 %v3371_v19, %v3056_v18  ;;  %v1544_v41 = vpop.f32.mrb[11].mxu1 }
0x1045   :  { %v4296_v21 = vadd.f32 %v3056_v18, %v1544_v41 }
0x1047   :  { %3376 = vmatprep.mubr.msk.f32.mxu1 %vm221_vm1, %v4296_v21  ;;  %v4302_v39 = vpack.i.bf16 %v4294_v20, %v4296_v21 }
0x1049   :  { %3727 = vrot.lane.b32.xlu1 %v4302_v39, %s3881_s24  ;;  %3722 = vrot.lane.b32.xlu0 %v4302_v39, %s3882_s6  ;;  %s4603_s24 = smov 64   ;;  %s4604_s6 = smov 80  }
0x104d   :  { %1757 = vrot.lane.b32.xlu1 %v4296_v21, %s3883_s25 }
0x1051   :  { %1759 = vrot.lane.b32.xlu1 %v4294_v20, %s3883_s25  ;;  %s4605_s25 = smov 112  }
0x10bb   :  { %v3728_v22 = vpop.permute.xlu1 %3727  ;;  %v3723_v23 = vpop.permute.xlu0 %3722 }
0x10bc   :  { %v3730_v24 = vunpack.i.h.bf16 %v3728_v22  ;;  %v3729_v25 = vunpack.i.l.bf16 %v3728_v22  ;;  %v3725_v26 = vunpack.i.h.bf16 %v3723_v23  ;;  %v3724_v27 = vunpack.i.l.bf16 %v3723_v23 }
0x10be   :  { %v3579_v28 = vpack.c.bf16 %v3725_v26, %v3724_v27  ;;  %v3589_v29 = vpack.c.bf16 %v3730_v24, %v3729_v25 }
0x10bf   :  { %v1758_v30 = vpop.permute.xlu1 %1757 }
0x10c0   :  { %3581 = vmatprep.subr.msk.bf16.mxu1 %vm4076_vm2, %v3579_v28 }
0x10c1   :  { %3584 = vmatpush3.bf16.xpose.msk.msra.mxu1 %vm4076_vm2, %v3579_v28 }
0x10c2   :  { %3591 = vmatprep.subr.msk.bf16.mxu1 %vm4076_vm2, %v3589_v29 }
0x10c3   :  { %v1760_v31 = vpop.permute.xlu1 %1759 }
0x10c8   :  { %3377 = vmatmul.mubr.msk.f32.vlgmr.msra.gmra.mrb[12].mxu1 %vm221_vm1, %v4294_v20 }
0x10c9   :  { %3594 = vmatpush3.bf16.xpose.msk.msra.mxu1 %vm4076_vm2, %v3589_v29  ;;  %3390 = vmatprep.mubr.msk.f32.mxu1 %vm221_vm1, %v1758_v30 }
0x10d0   :  { %3391 = vmatmul.mubr.msk.f32.vlgmr.msra.gmra.mrb[14].mxu1 %vm221_vm1, %v1760_v31 }
0x119b   :  { %v3378_v32 = vpop.f32.mrb[12].mxu1 }
0x119c   :  { %v1643_v33 = vmul.f32 0.35355338, %v3378_v32  ;;  %v1633_v35 = vpop.f32.mrb[13].mxu1 }
0x119d   :  { %v1642_v37 = vmul.f32 0.35355338, %v1633_v35 }
0x119e   :  { %v1645_v38 = vadd.f32 %v1643_v33, %v4095_v55 }
0x119f   :  { %v1644_v40 = vadd.f32 %v1642_v37, %v4100_v58 }
0x11a0   :  { %v1649_v43 = vsel %vm309_vm3, %v1645_v38, -inf }
0x11a1   :  { %1650 = vmax.xlane.f32.xlu1 %v1649_v43  ;;  %v1646_v36 = vsel %vm309_vm3, %v1644_v40, -inf }
0x11a2   :  { %1647 = vmax.xlane.f32.xlu0 %v1646_v36 }
0x11a3   :  { %v3392_v34 = vpop.f32.mrb[14].mxu1 }
0x11a4   :  { %v1839_v44 = vpop.f32.mrb[15].mxu1  ;;  %v1849_v45 = vmul.f32 0.35355338, %v3392_v34 }
0x11a5   :  { %v1848_v46 = vmul.f32 0.35355338, %v1839_v44 }
0x11a6   :  { %v1851_v50 = vadd.f32 %v1849_v45, %v4095_v55 }
0x11a7   :  { %v1850_v47 = vadd.f32 %v1848_v46, %v4100_v58 }
0x11a8   :  { %v1855_v51 = vsel %vm309_vm3, %v1851_v50, -inf }
0x11a9   :  { %v1852_v48 = vsel %vm309_vm3, %v1850_v47, -inf }
0x11aa   :  { %1853 = vmax.xlane.f32.xlu0 %v1852_v48 }
0x11ae   :  { %1856 = vmax.xlane.f32.xlu0 %v1855_v51 }
0x122e   :  { %v1651_v52 = vpop.xlane.xlu1 %1650 }
0x122f   :  { %v1653_v53 = vsub.f32 %v1645_v38, %v1651_v52  ;;  %v1648_v54 = vpop.xlane.xlu0 %1647 }
0x1230   :  { %v1652_v56 = vsub.f32 %v1644_v40, %v1648_v54 }
0x1231   :  { %v1656_v57 = vmul.f32 1.442695, %v1653_v53 }
0x1232   :  { %v1654_v59 = vmul.f32 1.442695, %v1652_v56 }
0x1233   :  { %3809 = vpow2.f32 %v1656_v57 }
0x1234   :  { %3811 = vpow2.f32 %v1654_v59 }
0x1237   :  { %v1854_v60 = vpop.xlane.xlu0 %1853 }
0x1238   :  { %v1858_v42 = vsub.f32 %v1850_v47, %v1854_v60  ;;  %v3855_v47 = vld [vmem:[%s4601_s27 + $0x8] sm:$0xff] }
0x123a   :  { %v1860_v61 = vmul.f32 1.442695, %v1858_v42 }
0x123b   :  { %v1857_v58 = vpop.xlane.xlu0 %1856 }
0x123c   :  { %3813 = vpow2.f32 %v1860_v61  ;;  %v1859_v62 = vsub.f32 %v1851_v50, %v1857_v58  ;;  %v3856_v50 = vld [vmem:[%s4601_s27] sm:$0xff]  ;;  %s4608_s27 = smov 72  }
0x123d   :  { %v3810_v63 = vpop.eup %3809 }
0x123e   :  { %v3812_v55 = vpop.eup %3811  ;;  %v1862_v0 = vmul.f32 1.442695, %v1859_v62  ;;  %v1661_v2 = vsel %vm309_vm3, %v3810_v63, 0.0 }
0x123f   :  { %1662 = vadd.xlane.f32.xlu1 %v1661_v2  ;;  %v1658_v3 = vsel %vm309_vm3, %v3812_v55, 0.0 }
0x1240   :  { %3815 = vpow2.f32 %v1862_v0  ;;  %1659 = vadd.xlane.f32.xlu0 %v1658_v3 }
0x1246   :  { %v3814_v4 = vpop.eup %3813 }
0x1247   :  { %v1864_v5 = vsel %vm309_vm3, %v3814_v4, 0.0 }
0x1248   :  { %1865 = vadd.xlane.f32.xlu0 %v1864_v5 }
0x124a   :  { %v3816_v6 = vpop.eup %3815 }
0x124b   :  { %v1867_v7 = vsel %vm309_vm3, %v3816_v6, 0.0 }
0x124c   :  { %1868 = vadd.xlane.f32.xlu1 %v1867_v7 }
0x125d   :  { %3737 = vrot.lane.b32.xlu1 %v4302_v39, %s4602_s1 }
0x125e   :  { %3732 = vrot.lane.b32.xlu0 %v4302_v39, %s4603_s24 }
0x1261   :  { %3742 = vrot.lane.b32.xlu1 %v4302_v39, %s4604_s6 }
0x1262   :  { %1973 = vrot.lane.b32.xlu0 %v4294_v20, %s4605_s25 }
0x1265   :  { %1971 = vrot.lane.b32.xlu1 %v4296_v21, %s4605_s25 }
0x12cc   :  { %v1663_v9 = vpop.xlane.xlu1 %1662 }
0x12cd   :  { %v1660_v8 = vpop.xlane.xlu0 %1659 }
0x12ce   :  { %3817 = vrcp.f32 %v1660_v8 }
0x12cf   :  { %3819 = vrcp.f32 %v1663_v9 }
0x12d5   :  { %v1866_v10 = vpop.xlane.xlu0 %1865 }
0x12d6   :  { %3821 = vrcp.f32 %v1866_v10 }
0x12d8   :  { %v3818_v11 = vpop.eup %3817 }
0x12d9   :  { %v1869_v1 = vpop.xlane.xlu1 %1868  ;;  %v3733_v12 = vpop.permute.xlu0 %3732  ;;  %v1666_v13 = vmul.f32 %v3818_v11, %v3812_v55 }
0x12da   :  { %3823 = vrcp.f32 %v1869_v1  ;;  %v3735_v14 = vunpack.i.h.bf16 %v3733_v12  ;;  %v3734_v15 = vunpack.i.l.bf16 %v3733_v12  ;;  %v3820_v19 = vpop.eup %3819 }
0x12db   :  { %3383 = vmatprep.mubr.msk.f32.mxu0 %vm309_vm3, %v1666_v13  ;;  %v1667_v25 = vmul.f32 %v3820_v19, %v3810_v63 }
0x12dc   :  { %v3585_v18 = vpack.c.bf16 %v3735_v14, %v3734_v15 }
0x12dd   :  { %v3738_v41 = vpop.permute.xlu1 %3737  ;;  %v1974_v37 = vpop.permute.xlu0 %1973 }
0x12de   :  { %v3740_v22 = vunpack.i.h.bf16 %v3738_v41  ;;  %v3739_v23 = vunpack.i.l.bf16 %v3738_v41  ;;  %3586 = vmatprep.subr.bf16.mxu0 %v3585_v18 }
0x12df   :  { %3588 = vmatpush3.bf16.msra.mxu0 %v3585_v18 }
0x12e0   :  { %v3822_v24 = vpop.eup %3821  ;;  %v3595_v26 = vpack.c.bf16 %v3740_v22, %v3739_v23 }
0x12e1   :  { %v3743_v27 = vpop.permute.xlu1 %3742  ;;  %v1872_v28 = vmul.f32 %v3822_v24, %v3814_v4 }
0x12e2   :  { %v3745_v29 = vunpack.i.h.bf16 %v3743_v27  ;;  %v3744_v30 = vunpack.i.l.bf16 %v3743_v27  ;;  %3384 = vmatmul.mubr.msk.f32.vlgmr.msra.gmra.mrb[14].mxu0 %vm309_vm3, %v1667_v25  ;;  %3596 = vmatprep.subr.bf16.mxu0 %v3595_v26 }
0x12e3   :  { %3598 = vmatpush3.bf16.msra.mxu0 %v3595_v26  ;;  %3397 = vmatprep.mubr.msk.f32.mxu0 %vm309_vm3, %v1872_v28 }
0x12e4   :  { %v3824_v31 = vpop.eup %3823  ;;  %v3599_v32 = vpack.c.bf16 %v3745_v29, %v3744_v30 }
0x12e5   :  { %v1873_v33 = vmul.f32 %v3824_v31, %v3816_v6  ;;  %v1972_v35 = vpop.permute.xlu1 %1971 }
0x12e6   :  { %3601 = vmatprep.subr.msk.bf16.mxu0 %vm4076_vm2, %v3599_v32 }
0x12e7   :  { %3398 = vmatmul.mubr.msk.f32.vlgmr.msra.gmra.mrb[16].mxu0 %vm309_vm3, %v1873_v33 }
0x12e8   :  { %3404 = vmatprep.mubr.msk.f32.mxu0 %vm221_vm1, %v1972_v35 }
0x12ec   :  { %3604 = vmatpush3.bf16.xpose.msk.msra.mxu0 %vm4076_vm2, %v3599_v32 }
0x12f3   :  { %3405 = vmatmul.mubr.msk.f32.vlgmr.msra.gmra.mrb[18].mxu0 %vm221_vm1, %v1974_v37 }
0x13b5   :  { %v3385_v38 = vpop.f32.mrb[14].mxu0 }
0x13b6   :  { %1756 = vst.msk [vmem:[#allocation2 + $0x8] sm:$0xff] %vm221_vm1, %v3385_v38  ;;  %v1746_v40 = vpop.f32.mrb[15].mxu0 }
0x13b7   :  { %1755 = vst.msk [vmem:[#allocation2] sm:$0xff] %vm221_vm1, %v1746_v40 }
0x13ba   :  { %v4358_v43 = vpop.f32.mrb[16].mxu0 }
0x13bb   :  { %v4360_v36 = vpop.f32.mrb[17].mxu0 }
0x13c6   :  { %v3406_v34 = vpop.f32.mrb[18].mxu0 }
0x13c7   :  { %v2063_v44 = vmul.f32 0.35355338, %v3406_v34  ;;  %v2053_v45 = vpop.f32.mrb[19].mxu0 }
0x13c8   :  { %v2062_v46 = vmul.f32 0.35355338, %v2053_v45 }
0x13c9   :  { %v2065_v48 = vadd.f32 %v3855_v47, %v2063_v44 }
0x13ca   :  { %v2064_v51 = vadd.f32 %v3856_v50, %v2062_v46 }
0x13cb   :  { %v2069_v52 = vsel %vm309_vm3, %v2065_v48, -inf }
0x13cc   :  { %2070 = vmax.xlane.f32.xlu0 %v2069_v52  ;;  %v2066_v53 = vsel %vm309_vm3, %v2064_v51, -inf }
0x13cd   :  { %2067 = vmax.xlane.f32.xlu1 %v2066_v53  ;;  %v3084_v53 = vld [vmem:[%s4551_s7 + $0x28] sm:$0xff] }
0x13de   :  { %3747 = vrot.lane.b32.xlu1 %v4302_v39, %s4606_s30 }
0x13e2   :  { %2185 = vrot.lane.b32.xlu1 %v4296_v21, %s4607_s26 }
0x13e6   :  { %2187 = vrot.lane.b32.xlu1 %v4294_v20, %s4607_s26 }
0x1459   :  { %v2071_v54 = vpop.xlane.xlu0 %2070 }
0x145a   :  { %v2073_v56 = vsub.f32 %v2065_v48, %v2071_v54  ;;  %v2068_v57 = vpop.xlane.xlu1 %2067 }
0x145b   :  { %v2072_v59 = vsub.f32 %v2064_v51, %v2068_v57  ;;  %v3086_v57 = vld [vmem:[%s4551_s7 + $0x38] sm:$0xff] }
0x145c   :  { %v2076_v60 = vmul.f32 1.442695, %v2073_v56  ;;  %v3085_v56 = vld [vmem:[%s4551_s7 + $0x30] sm:$0xff] }
0x145d   :  { %v2074_v42 = vmul.f32 1.442695, %v2072_v59  ;;  %v3623_v59 = vpack.c.bf16 %v3086_v57, %v3085_v56 }
0x145e   :  { %3825 = vpow2.f32 %v2076_v60  ;;  %v3748_v61 = vpop.permute.xlu1 %3747 }
0x145f   :  { %v3750_v58 = vunpack.i.h.bf16 %v3748_v61  ;;  %v3749_v62 = vunpack.i.l.bf16 %v3748_v61  ;;  %3827 = vpow2.f32 %v2074_v42 }
0x1461   :  { %v3605_v63 = vpack.c.bf16 %v3750_v58, %v3749_v62 }
0x1462   :  { %v2186_v1 = vpop.permute.xlu1 %2185 }
0x1463   :  { %3606 = vmatprep.subr.bf16.mxu1 %v3605_v63 }
0x1464   :  { %3608 = vmatpush3.bf16.msra.mxu1 %v3605_v63 }
0x1466   :  { %v2188_v12 = vpop.permute.xlu1 %2187 }
0x1468   :  { %v3826_v55 = vpop.eup %3825 }
0x1469   :  { %v2081_v21 = vsel %vm309_vm3, %v3826_v55, 0.0  ;;  %v3828_v0 = vpop.eup %3827 }
0x146a   :  { %2082 = vadd.xlane.f32.xlu0 %v2081_v21  ;;  %v2078_v20 = vsel %vm309_vm3, %v3828_v0, 0.0 }
0x146e   :  { %2079 = vadd.xlane.f32.xlu0 %v2078_v20 }
0x1484   :  { %3752 = vrot.lane.b32.xlu0 %v4302_v39, %s4608_s27 }
0x14f7   :  { %v2083_v2 = vpop.xlane.xlu0 %2082 }
0x14f8   :  { %3829 = vrcp.f32 %v2083_v2 }
0x14fb   :  { %v2080_v3 = vpop.xlane.xlu0 %2079 }
0x14fc   :  { %3831 = vrcp.f32 %v2080_v3 }
0x14ff   :  { %v3753_v4 = vpop.permute.xlu0 %3752 }
0x1500   :  { %v3755_v5 = vunpack.i.h.bf16 %v3753_v4  ;;  %v3754_v6 = vunpack.i.l.bf16 %v3753_v4 }
0x1502   :  { %v3609_v7 = vpack.c.bf16 %v3755_v5, %v3754_v6  ;;  %v3830_v8 = vpop.eup %3829 }
0x1503   :  { %v2087_v11 = vmul.f32 %v3830_v8, %v3826_v55  ;;  %v3088_v55 = vld [vmem:[%s4552_s8 + $0x1] ss:$0 sm:$0xff] }
0x1504   :  { %3611 = vmatprep.subr.msk.bf16.mxu1 %vm4076_vm2, %v3609_v7 }
0x1506   :  { %v3832_v9 = vpop.eup %3831 }
0x1507   :  { %v2086_v10 = vmul.f32 %v3832_v9, %v3828_v0 }
0x1509   :  { %3411 = vmatprep.mubr.msk.f32.mxu1 %vm309_vm3, %v2086_v10 }
0x150a   :  { %3412 = vmatmul.mubr.msk.f32.vlgmr.msra.gmra.mrb[16].mxu1 %vm309_vm3, %v2087_v11 }
0x150b   :  { %3614 = vmatpush3.bf16.xpose.msk.msra.mxu1 %vm4076_vm2, %v3609_v7  ;;  %3418 = vmatprep.mubr.msk.f32.mxu1 %vm221_vm1, %v2186_v1 }
0x1512   :  { %3419 = vmatmul.mubr.msk.f32.vlgmr.msra.gmra.mrb[18].mxu1 %vm221_vm1, %v2188_v12 }
0x15dd   :  { %v3413_v13 = vpop.f32.mrb[16].mxu1 }
0x15de   :  { %v2166_v14 = vpop.f32.mrb[17].mxu1 }
0x15e5   :  { %v3420_v15 = vpop.f32.mrb[18].mxu1 }
0x15e6   :  { %v2277_v18 = vmul.f32 0.35355338, %v3420_v15  ;;  %v2267_v19 = vpop.f32.mrb[19].mxu1  ;;  %v3096_v15 = vld [vmem:[%s4555_s11 + $0x28] sm:$0xff] }
0x15e7   :  { %v2276_v41 = vmul.f32 0.35355338, %v2267_v19  ;;  %v3097_v19 = vld [vmem:[%s4555_s11 + $0x30] sm:$0xff] }
0x15e8   :  { %v2279_v22 = vadd.f32 %v3855_v47, %v2277_v18 }
0x15e9   :  { %v2278_v23 = vadd.f32 %v3856_v50, %v2276_v41  ;;  %v3098_v41 = vld [vmem:[%s4555_s11 + $0x38] sm:$0xff] }
0x15ea   :  { %v2283_v24 = vsel %vm309_vm3, %v2279_v22, -inf }
0x15eb   :  { %2284 = vmax.xlane.f32.xlu0 %v2283_v24  ;;  %v2280_v25 = vsel %vm309_vm3, %v2278_v23, -inf }
0x15ec   :  { %2281 = vmax.xlane.f32.xlu1 %v2280_v25 }
0x15fd   :  { %3757 = vrot.lane.b32.xlu1 %v4302_v39, %s4609_s2 }
0x1601   :  { %1965 = vrot.lane.b32.xlu1 %v4358_v43, %s4610_s5 }
0x1605   :  { %2177 = vrot.lane.b32.xlu1 %v2166_v14, %s4611_s3 }
0x1609   :  { %2179 = vrot.lane.b32.xlu1 %v3413_v13, %s4611_s3 }
0x1678   :  { %v2285_v49 = vpop.xlane.xlu0 %2284 }
0x1679   :  { %v2287_v26 = vsub.f32 %v2279_v22, %v2285_v49  ;;  %v2282_v27 = vpop.xlane.xlu1 %2281  ;;  %v3631_v22 = vpack.c.bf16 %v3098_v41, %v3097_v19 }
0x167a   :  { %v2286_v28 = vsub.f32 %v2278_v23, %v2282_v27 }
0x167b   :  { %v2290_v29 = vmul.f32 1.442695, %v2287_v26 }
0x167c   :  { %v2288_v30 = vmul.f32 1.442695, %v2286_v28 }
0x167d   :  { %v3758_v31 = vpop.permute.xlu1 %3757 }
0x167e   :  { %3833 = vpow2.f32 %v2288_v30  ;;  %v3760_v32 = vunpack.i.h.bf16 %v3758_v31  ;;  %v3759_v33 = vunpack.i.l.bf16 %v3758_v31  ;;  %v3094_v31 = vld [vmem:[%s4554_s10 + $0x1] ss:$0 sm:$0xff] }
0x167f   :  { %3835 = vpow2.f32 %v2290_v29  ;;  %v3093_v29 = vld [vmem:[%s4553_s9 + $0x1] ss:$0 sm:$0xff] }
0x1680   :  { %v3615_v35 = vpack.c.bf16 %v3760_v32, %v3759_v33 }
0x1681   :  { %v1966_v39 = vpop.permute.xlu1 %1965 }
0x1682   :  { %1970 = vst.msk [vmem:[#allocation2 + $0x8] sm:$0xff] %vm633_vm4, %v1966_v39  ;;  %3616 = vmatprep.subr.bf16.mxu0 %v3615_v35 }
0x1683   :  { %3618 = vmatpush3.bf16.msra.mxu0 %v3615_v35 }
0x1685   :  { %v2178_v37 = vpop.permute.xlu1 %2177 }
0x1688   :  { %v3834_v38 = vpop.eup %3833 }
0x1689   :  { %v2180_v40 = vpop.permute.xlu1 %2179  ;;  %v2292_v43 = vsel %vm309_vm3, %v3834_v38, 0.0  ;;  %v3836_v34 = vpop.eup %3835 }
0x168a   :  { %2184 = vst.msk [vmem:[#allocation2 + $0x8] sm:$0xff] %vm848_vm5, %v2180_v40  ;;  %2293 = vadd.xlane.f32.xlu0 %v2292_v43  ;;  %v2295_v44 = vsel %vm309_vm3, %v3836_v34, 0.0  ;;  %v3103_v40 = vld [vmem:[%s4557_s13 + $0x40] sm:$0xff]  ;;  %v3104_v43 = vld [vmem:[%s4557_s13 + $0x48] sm:$0xff] }
0x168e   :  { %2296 = vadd.xlane.f32.xlu0 %v2295_v44  ;;  %v3105_v44 = vld [vmem:[%s4557_s13 + $0x50] sm:$0xff] }
0x16a4   :  { %1963 = vrot.lane.b32.xlu0 %v4360_v36, %s4610_s5  ;;  %v3083_v36 = vld [vmem:[%s4551_s7 + $0x20] sm:$0xff] }
0x16a5   :  { %v3619_v54 = vpack.c.bf16 %v3084_v53, %v3083_v36  ;;  %v3100_v53 = vld [vmem:[%s4556_s12 + $0x1] ss:$0 sm:$0xff] }
0x16a7   :  { %3620 = vmatprep.subr.bf16.mxu0 %v3619_v54 }
0x1717   :  { %v2294_v45 = vpop.xlane.xlu0 %2293 }
0x1718   :  { %3837 = vrcp.f32 %v2294_v45  ;;  %v3106_v45 = vld [vmem:[%s4557_s13 + $0x58] sm:$0xff] }
0x171b   :  { %v2297_v46 = vpop.xlane.xlu0 %2296 }
0x171c   :  { %3839 = vrcp.f32 %v2297_v46  ;;  %v3107_v46 = vld [vmem:[%s4557_s13 + $0x60] sm:$0xff] }
0x171f   :  { %v1964_v47 = vpop.permute.xlu0 %1963 }
0x1720   :  { %1969 = vst.msk [vmem:[#allocation2] sm:$0xff] %vm633_vm4, %v1964_v47  ;;  %v3639_v47 = vpack.c.bf16 %v3106_v45, %v3105_v44 }
0x1721   :  { %2183 = vst.msk [vmem:[#allocation2] sm:$0xff] %vm848_vm5, %v2178_v37 }
0x1722   :  { %v3838_v48 = vpop.eup %3837 }
0x1723   :  { %v2300_v50 = vmul.f32 %v3838_v48, %v3834_v38  ;;  %v3108_v48 = vld [vmem:[%s4557_s13 + $0x68] sm:$0xff] }
0x1725   :  { %3425 = vmatprep.mubr.msk.f32.mxu0 %vm309_vm3, %v2300_v50  ;;  %v3643_v50 = vpack.c.bf16 %v3108_v48, %v3107_v46  ;;  %v3117_v46 = vld [vmem:[%s4559_s15 + $0x1] ss:$0 sm:$0xff] }
0x1726   :  { %v3840_v51 = vpop.eup %3839 }
0x1727   :  { %v2301_v52 = vmul.f32 %v3840_v51, %v3836_v34  ;;  %v3635_v34 = vpack.c.bf16 %v3104_v43, %v3103_v40  ;;  %v3109_v51 = vld [vmem:[%s4557_s13 + $0x70] sm:$0xff] }
0x1729   :  { %3426 = vmatmul.mubr.msk.f32.vlgmr.msra.gmra.mrb[20].mxu0 %vm309_vm3, %v2301_v52  ;;  %v3110_v52 = vld [vmem:[%s4557_s13 + $0x78] sm:$0xff] }
0x172a   :  { %3622 = vmatpush3.bf16.msra.mxu0 %v3619_v54  ;;  %v3647_v36 = vpack.c.bf16 %v3110_v52, %v3109_v51  ;;  %v3118_v51 = vld [vmem:[%s4560_s16 + $0x1] ss:$0 sm:$0xff] }
0x172b   :  { %3624 = vmatprep.subr.bf16.mxu0 %v3623_v59 }
0x172e   :  { %3626 = vmatpush3.bf16.msra.mxu0 %v3623_v59 }
0x172f   :  { %3636 = vmatprep.subr.bf16.mxu0 %v3635_v34 }
0x17fc   :  { %v3427_v60 = vpop.f32.mrb[20].mxu0 }
0x17fd   :  { %2393 = vrot.lane.b32.xlu1 %v3427_v60, %s4612_s20  ;;  %v2380_v42 = vpop.f32.mrb[21].mxu0 }
0x17fe   :  { %2391 = vrot.lane.b32.xlu0 %v2380_v42, %s4612_s20 }
0x186f   :  { %v2394_v61 = vpop.permute.xlu1 %2393 }
0x1870   :  { %2398 = vst.msk [vmem:[#allocation2 + $0x8] sm:$0xff] %vm1063_vm6, %v2394_v61  ;;  %v2392_v58 = vpop.permute.xlu0 %2391 }
0x1871   :  { %2397 = vst.msk [vmem:[#allocation2] sm:$0xff] %vm1063_vm6, %v2392_v58 }
0x1877   :  { %v2400_v63 = vld [vmem:[#allocation2 + $0x8] sm:$0xff] }
0x1878   :  { %v2399_v62 = vld [vmem:[#allocation2] sm:$0xff] }
0x1879   :  { %3436 = vmatprep.mubr.msk.f32.mxu0 %vm79_vm0, %v2399_v62 }
0x187a   :  { %3437 = vmatmul.mubr.msk.f32.vlgmr.msra.gmra.mrb[22].mxu0 %vm79_vm0, %v2400_v63 }
0x187b   :  { %3638 = vmatpush3.bf16.msra.mxu0 %v3635_v34 }
0x187c   :  { %3640 = vmatprep.subr.bf16.mxu0 %v3639_v47 }
0x187f   :  { %3642 = vmatpush3.bf16.msra.mxu0 %v3639_v47 }
0x1880   :  { %3644 = vmatprep.subr.bf16.mxu0 %v3643_v50 }
0x1883   :  { %3646 = vmatpush3.bf16.msra.mxu0 %v3643_v50 }
0x1884   :  { %3648 = vmatprep.subr.bf16.mxu0 %v3647_v36 }
0x1887   :  { %3650 = vmatpush3.bf16.msra.mxu0 %v3647_v36 }
0x194d   :  { %v3438_v21 = vpop.f32.mrb[22].mxu0 }
0x194e   :  { %v2492_v0 = vadd.f32 %v3438_v21, %v3088_v55  ;;  %v2486_v20 = vpop.f32.mrb[23].mxu0 }
0x194f   :  { %v2487_v2 = vadd.f32 %v3088_v55, %v2486_v20 }
0x1950   :  { %v2496_v3 = vadd.f32 %v2492_v0, %v4285_v17 }
0x1951   :  { %v2495_v4 = vadd.f32 %v2487_v2, %v4283_v16  ;;  %v3095_v16 = vld [vmem:[%s4555_s11 + $0x20] sm:$0xff] }
0x1952   :  { %v2504_v5 = vsel %vm79_vm0, %v2496_v3, 0.0  ;;  %v3627_v18 = vpack.c.bf16 %v3096_v15, %v3095_v16 }
0x1953   :  { %2505 = vadd.xlane.f32.xlu1 %v2504_v5  ;;  %v2501_v6 = vsel %vm79_vm0, %v2495_v4, 0.0 }
0x1954   :  { %2502 = vadd.xlane.f32.xlu0 %v2501_v6  ;;  %3628 = vmatprep.subr.bf16.mxu1 %v3627_v18 }
0x1955   :  { %3630 = vmatpush3.bf16.msra.mxu1 %v3627_v18 }
0x1956   :  { %3632 = vmatprep.subr.bf16.mxu1 %v3631_v22 }
0x1959   :  { %3634 = vmatpush3.bf16.msra.mxu1 %v3631_v22 }
0x19e0   :  { %v2506_v7 = vpop.xlane.xlu1 %2505 }
0x19e1   :  { %v2508_v8 = vmul.f32 0.03125, %v2506_v7  ;;  %v2503_v9 = vpop.xlane.xlu0 %2502 }
0x19e2   :  { %v2507_v10 = vmul.f32 0.03125, %v2503_v9 }
0x19e3   :  { %v2510_v11 = vsub.f32 %v2496_v3, %v2508_v8 }
0x19e4   :  { %v2509_v1 = vsub.f32 %v2495_v4, %v2507_v10  ;;  %v3112_v10 = vld [vmem:[%s4558_s14 + $0x1] ss:$0 sm:$0xff] }
0x19e5   :  { %v2512_v14 = vmul.f32 %v2510_v11, %v2510_v11 }
0x19e6   :  { %v2511_v12 = vmul.f32 %v2509_v1, %v2509_v1 }
0x19e7   :  { %v2516_v17 = vsel %vm79_vm0, %v2512_v14, 0.0 }
0x19e8   :  { %v2513_v13 = vsel %vm79_vm0, %v2511_v12, 0.0 }
0x19e9   :  { %2514 = vadd.xlane.f32.xlu0 %v2513_v13 }
0x19ed   :  { %2517 = vadd.xlane.f32.xlu0 %v2516_v17 }
0x1a76   :  { %v2515_v23 = vpop.xlane.xlu0 %2514 }
0x1a77   :  { %v2519_v24 = vmul.f32 0.03125, %v2515_v23 }
0x1a79   :  { %v2521_v25 = vadd.f32 1e-12, %v2519_v24 }
0x1a7a   :  { %v2518_v49 = vpop.xlane.xlu0 %2517 }
0x1a7b   :  { %3841 = vrsqrt.f32 %v2521_v25  ;;  %v2520_v26 = vmul.f32 0.03125, %v2518_v49 }
0x1a7d   :  { %v2522_v27 = vadd.f32 1e-12, %v2520_v26 }
0x1a7f   :  { %3843 = vrsqrt.f32 %v2522_v27 }
0x1a85   :  { %v3842_v28 = vpop.eup %3841 }
0x1a86   :  { %v2525_v30 = vmul.f32 %v3842_v28, %v2509_v1  ;;  %v2806_v28 = vld [vmem:[%s4561_s17] sm:$0xff] }
0x1a88   :  { %v2533_v32 = vmul.f32 %v3093_v29, %v2525_v30 }
0x1a89   :  { %v3844_v33 = vpop.eup %3843 }
0x1a8a   :  { %v2526_v35 = vmul.f32 %v3844_v33, %v2510_v11  ;;  %v2541_v39 = vadd.f32 %v3094_v31, %v2533_v32  ;;  %v2808_v32 = vld [vmem:[%s4561_s17 + $0x10] sm:$0xff]  ;;  %v2809_v33 = vld [vmem:[%s4561_s17 + $0x18] sm:$0xff] }
0x1a8c   :  { %v2534_v37 = vmul.f32 %v3093_v29, %v2526_v35  ;;  %3447 = vmatprep.mubr.msk.f32.mxu1 %vm79_vm0, %v2541_v39  ;;  %v2807_v29 = vld [vmem:[%s4561_s17 + $0x8] sm:$0xff]  ;;  %v3655_v35 = vpack.c.bf16 %v2809_v33, %v2808_v32 }
0x1a8d   :  { %v3652_v30 = vpack.c.bf16 %v2807_v29, %v2806_v28 }
0x1a8e   :  { %v2542_v38 = vadd.f32 %v3094_v31, %v2534_v37  ;;  %v3895_v31 = vmov 0.0|0.0  }
0x1a8f   :  { %3651 = vmatprep.subr.bf16.mxu1 %v3895_v31 }
0x1a90   :  { %3448 = vmatmul.mubr.msk.f32.vlgmr.msra.gmra.mrb[20].mxu1 %vm79_vm0, %v2542_v38 }
0x1a91   :  { %3653 = vmatpush3.bf16.msra.mxu1 %v3652_v30 }
0x1a92   :  { %3654 = vmatprep.subr.bf16.mxu1 %v3895_v31 }
0x1a95   :  { %3656 = vmatpush3.bf16.msra.mxu1 %v3655_v35 }
0x1a96   :  { %3657 = vmatprep.subr.bf16.mxu1 %v3895_v31 }
0x1b63   :  { %v3449_v54 = vpop.f32.mrb[20].mxu1 }
0x1b64   :  { %v2634_v56 = vadd.f32 %v3449_v54, %v3100_v53  ;;  %v2628_v57 = vpop.f32.mrb[21].mxu1 }
0x1b65   :  { %v2629_v59 = vadd.f32 %v3100_v53, %v2628_v57 }
0x1b66   :  { %v2640_v60 = vmul.f32 0.044715, %v2634_v56  ;;  %v2638_v7 = vmul.f32 0.5, %v2634_v56 }
0x1b67   :  { %v2639_v42 = vmul.f32 0.044715, %v2629_v59  ;;  %v2637_v5 = vmul.f32 0.5, %v2629_v59 }
0x1b68   :  { %v2642_v61 = vmul.f32 %v2640_v60, %v2634_v56  ;;  %v2892_v60 = vld [vmem:[%s4563_s19 + $0x8] sm:$0xff] }
0x1b69   :  { %v2641_v58 = vmul.f32 %v2639_v42, %v2629_v59  ;;  %v2893_v42 = vld [vmem:[%s4563_s19 + $0x10] sm:$0xff] }
0x1b6a   :  { %v2644_v62 = vmul.f32 %v2642_v61, %v2634_v56 }
0x1b6b   :  { %v2643_v63 = vmul.f32 %v2641_v58, %v2629_v59  ;;  %v2894_v58 = vld [vmem:[%s4563_s19 + $0x18] sm:$0xff] }
0x1b6c   :  { %v2646_v55 = vadd.f32 %v2644_v62, %v2634_v56  ;;  %v3661_v62 = vpack.c.bf16 %v2894_v58, %v2893_v42 }
0x1b6d   :  { %v2645_v21 = vadd.f32 %v2643_v63, %v2629_v59  ;;  %v2891_v59 = vld [vmem:[%s4563_s19] sm:$0xff] }
0x1b6e   :  { %v2648_v0 = vmul.f32 0.7978846, %v2646_v55  ;;  %v3658_v61 = vpack.c.bf16 %v2892_v60, %v2891_v59  ;;  %v3119_v63 = vld [vmem:[%s4562_s18] ss:$0 sm:$0xff]  ;;  %s3898_s18 = smov [#allocation4]  }
0x1b6f   :  { %v2647_v20 = vmul.f32 0.7978846, %v2645_v21  ;;  %s2997_s13 = sshll.u32 %s3898_s18, 4  ;;  %s2998_s13 = int_to_ptr.vmem [resolvable:$true] %s2997_s13 }
0x1b70   :  { %3845 = vtanh.f32 %v2648_v0  ;;  %s3857_s14 = scalar_lea.vmem %s2998_s13, 16  ;;  %s3861_s1 = scalar_lea.vmem %s2998_s13, 32 }
0x1b71   :  { %3847 = vtanh.f32 %v2647_v20  ;;  %p3858_p0 = scmp.ne.s32.totalorder %s2998_s13, %s3857_s14  ;;  %p3862_p1 = scmp.lt.s32.totalorder %s2998_s13, %s2998_s13 }
0x1b72   :  { %p3863_p2 = scmp.lt.s32.totalorder %s3861_s1, %s3857_s14 }
0x1b74   :  { %p3864_p3 = por %p3863_p2, %p3862_p1 }
0x1b76   :  { %p3865_p4 = pnand %p3864_p3, %p3858_p0 }
0x1b7a   :  { %v3846_v2 = vpop.eup %3845 }
0x1b7b   :  { %v3848_v3 = vpop.eup %3847  ;;  %v2652_v4 = vadd.f32 1.0, %v3846_v2  ;;  %v3121_v2 = vld [vmem:[#allocation3] ss:$0 sm:$0xff] }
0x1b7c   :  { %v2651_v6 = vadd.f32 1.0, %v3848_v3 }
0x1b7d   :  { %v2654_v9 = vmul.f32 %v2652_v4, %v2638_v7  ;;  %v2977_v4 = vld [vmem:[%s4613_s28] sm:$0x3] }
0x1b7e   :  { %v2653_v8 = vmul.f32 %v2651_v6, %v2637_v5 }
0x1b80   :  { %3466 = vmatprep.mubr.msk.f32.mxu0 %vm1331_vm7, %v2653_v8 }
0x1b81   :  { %3467 = vmatmul.mubr.msk.f32.vlgmr.msra.gmra.mrb[24].mxu0 %vm1331_vm7, %v2654_v9 }
0x1c54   :  { %v3468_v11 = vpop.f32.mrb[24].mxu0 }
0x1c55   :  { %v2750_v1 = vadd.f32 %v3468_v11, %v3112_v10  ;;  %v2744_v12 = vpop.f32.mrb[25].mxu0 }
0x1c56   :  { %v2745_v13 = vadd.f32 %v3112_v10, %v2744_v12 }
0x1c57   :  { %v2754_v14 = vadd.f32 %v2750_v1, %v2542_v38 }
0x1c58   :  { %v2753_v17 = vadd.f32 %v2745_v13, %v2541_v39  ;;  %v3897_v39 = vmov 0.0  }
0x1c59   :  { %v2762_v16 = vsel %vm79_vm0, %v2754_v14, 0.0  ;;  %3477 = vmatprep.mubr.msk.f32.mxu1 %vm3896_vm8, %v3897_v39 }
0x1c5a   :  { %2763 = vadd.xlane.f32.xlu0 %v2762_v16  ;;  %v2759_v15 = vsel %vm79_vm0, %v2753_v17, 0.0 }
0x1c5b   :  { %2760 = vadd.xlane.f32.xlu1 %v2759_v15 }
0x1ce7   :  { %v2764_v18 = vpop.xlane.xlu0 %2763 }
0x1ce8   :  { %v2766_v19 = vmul.f32 0.03125, %v2764_v18  ;;  %v2761_v41 = vpop.xlane.xlu1 %2760 }
0x1ce9   :  { %v2765_v22 = vmul.f32 0.03125, %v2761_v41 }
0x1cea   :  { %v2768_v23 = vsub.f32 %v2754_v14, %v2766_v19 }
0x1ceb   :  { %v2767_v24 = vsub.f32 %v2753_v17, %v2765_v22 }
0x1cec   :  { %v2770_v25 = vmul.f32 %v2768_v23, %v2768_v23 }
0x1ced   :  { %v2769_v49 = vmul.f32 %v2767_v24, %v2767_v24 }
0x1cee   :  { %v2774_v26 = vsel %vm79_vm0, %v2770_v25, 0.0 }
0x1cef   :  { %2775 = vadd.xlane.f32.xlu0 %v2774_v26  ;;  %v2771_v27 = vsel %vm79_vm0, %v2769_v49, 0.0 }
0x1cf0   :  { %2772 = vadd.xlane.f32.xlu1 %v2771_v27 }
0x1d7c   :  { %v2776_v37 = vpop.xlane.xlu0 %2775 }
0x1d7d   :  { %v2778_v38 = vmul.f32 0.03125, %v2776_v37  ;;  %v2773_v40 = vpop.xlane.xlu1 %2772 }
0x1d7e   :  { %v2777_v43 = vmul.f32 0.03125, %v2773_v40 }
0x1d7f   :  { %v2780_v34 = vadd.f32 1e-12, %v2778_v38 }
0x1d80   :  { %v2779_v44 = vadd.f32 1e-12, %v2777_v43 }
0x1d81   :  { %3849 = vrsqrt.f32 %v2780_v34 }
0x1d82   :  { %3851 = vrsqrt.f32 %v2779_v44 }
0x1d8b   :  { %v3850_v45 = vpop.eup %3849 }
0x1d8c   :  { %v3852_v47 = vpop.eup %3851  ;;  %v2784_v48 = vmul.f32 %v3850_v45, %v2768_v23 }
0x1d8d   :  { %v2783_v50 = vmul.f32 %v3852_v47, %v2767_v24 }
0x1d8e   :  { %v2792_v52 = vmul.f32 %v3117_v46, %v2784_v48 }
0x1d8f   :  { %v2791_v36 = vmul.f32 %v3117_v46, %v2783_v50 }
0x1d90   :  { %v2800_v53 = vadd.f32 %v3118_v51, %v2792_v52 }
0x1d91   :  { %v2799_v54 = vadd.f32 %v3118_v51, %v2791_v36 }
0x1d92   :  { %v2802_v56 = vrot.slane %v2800_v53, 7 }
0x1d94   :  { %v2805_v57 = vsel %vm2804_vm9, %v2799_v54, %v2802_v56 }
0x1d95   :  { %3478 = vmatmul.mubr.msk.f32.vlgmr.msra.gmra.mrb[22].mxu1 %vm79_vm0, %v2805_v57 }
0x1d96   :  { %3488 = vmatprep.mubr.msk.f32.mxu1 %vm3896_vm8, %v3897_v39  ;;  %3659 = vmatpush3.bf16.msra.mxu1 %v3658_v61 }
0x1d97   :  { %3660 = vmatprep.subr.bf16.mxu1 %v3895_v31 }
0x1d9a   :  { %3662 = vmatpush3.bf16.msra.mxu1 %v3661_v62 }
0x1e68   :  { %v2886_v55 = vpop.f32.mrb[22].mxu1 }
0x1e69   :  { %v2887_v21 = vadd.f32 %v3119_v63, %v2886_v55  ;;  %v3479_v0 = vpop.f32.mrb[23].mxu1 }
0x1e6b   :  { %3853 = vtanh.f32 %v2887_v21 }
0x1e75   :  { %v3854_v20 = vpop.eup %3853 }
0x1e76   :  { %3489 = vmatmul.mubr.msk.f32.vlgmr.msra.gmra.mrb[24].mxu1 %vm79_vm0, %v3854_v20 }
0x1f49   :  { %v2971_v3 = vpop.f32.mrb[24].mxu1 }
0x1f4a   :  { %v2972_v5 = vadd.f32 %v3121_v2, %v2971_v3  ;;  %v3490_v6 = vpop.f32.mrb[25].mxu1 }
0x1f4c   :  { %2976 = vst.msk [vmem:[%s4566_s22] sm:$0x3] %vm2975_vm10, %v2972_v5  ;;  %v2978_v7 = vsub.f32 %v2972_v5, %v2977_v4 }
0x1f4e   :  { %v2979_v8 = vmul.f32 %v2978_v7, %v2978_v7 }
0x1f50   :  { %v2981_v9 = vsel %vm2975_vm10, %v2979_v8, 0.0 }
0x1f51   :  { %v2982_v10 = vrot.slane %v2981_v9, 4 }
0x1f53   :  { %v2983_v11 = vadd.f32 %v2982_v10, %v2981_v9 }
0x1f55   :  { %v2984_v1 = vrot.slane %v2983_v11, 2 }
0x1f57   :  { %v2985_v12 = vadd.f32 %v2984_v1, %v2983_v11 }
0x1f59   :  { %v2986_v13 = vrot.slane %v2985_v12, 1 }
0x1f5b   :  { %v2987_v14 = vadd.f32 %v2986_v13, %v2985_v12 }
0x1f5d   :  { %v2988_v17 = vmul.f32 0.5, %v2987_v14 }
0x1f5f   :  { %2990 = vst.msk [vmem:[#allocation4] sm:$0x1] %vm2989_vm11, %v2988_v17 }
0x1f60   :  { %3868 = shalt.err (!%p3865_p4)
}
0x1f61   :  { %s3869_s6 = scalar_lea.hbm %s4565_s21, 16 }
0x1f62   :  { %p3870_p5 = scmp.ne.s32.totalorder %s4565_s21, %s3869_s6  ;;  %p3873_p6 = scmp.lt.u32.totalorder %s3869_s6, %s4565_s21 }
0x1f64   :  { %p3875_p7 = pnand %p3873_p6, %p3870_p5 }
0x1f66   :  { %3878 = shalt.err (!%p3875_p7)
}
0x1f67   :  { %3000 = dma.vmem_to_hbm [thread:$0]  %s2998_s13, 16, %s4565_s21, [#allocation5]  }
0x1f68   :  { %3879 = dma.done.wait [#allocation5], 16  }
0x1f69   :  { %3880 = vsyncadd [#allocation5], 4294967280 }
0x1f6a   :  { %3008 = vsyncpa [#allocation5], 1 }

</bundles_post_ra>
